<compile_context>
chip_gen: v7x
topology: tpu7x:2x2x1
jax: 0.10.0
libtpu: 0.0.40
codegen_flags: <defaults>
</compile_context>

<pallas_src>
import jax
import jax.numpy as jnp
from jax.experimental import pallas as pl
from jax.experimental.pallas import tpu as pltpu

LINEAR_SIZE = 256
KP_SIZE = 51
KP_PAD = 128          # keypoints padded 51 -> 128 (zero rows in w1)
EYES_FLAT = 900
EYES_PAD = 1024       # flattened eyes padded 900 -> 1024 (zero rows in w_eyes)
NUM_STAGE = 3
BN_EPS = 1e-5
BATCH_TILE = 512      # batch tile for the grid


# -----------------------------------------------------------------------------
# Pallas kernel: whole fused MLP forward for one batch tile
# -----------------------------------------------------------------------------
def _looking_fused_kernel(
    eyes_ref,      # (TB, 1024)   bf16  flattened + padded eye crops
    kp_ref,        # (TB, 128)    bf16  padded keypoints
    w_eyes_ref,    # (1024, 256)  bf16  Linear(900,256,no bias) with BN scale folded in
    w1_ref,        # (128, 256)   bf16  looking_model.w1 with BN scale folded in
    stage_w_ref,   # (6, 256,256) bf16  [s0.l1, s0.l2, s1.l1, ...] BN scales folded in
    shifts_ref,    # (8, 256)     f32   rows: [she, sh1, s0.l1, s0.l2, s1.l1, s1.l2, s2.l1, s2.l2]
    w2_ref,        # (1, 256)     f32   final projection row
    b2_ref,        # (1, 1)       f32   final bias (SMEM scalar)
    out_ref,       # (TB, 1)      f32
):
    f32 = jnp.float32
    bf16 = jnp.bfloat16

    # encoder_eyes: Flatten -> Linear(900,256,no bias) -> BN(eval) -> Dropout(eval) -> ReLU
    e = jnp.dot(eyes_ref[...], w_eyes_ref[...], preferred_element_type=f32)
    e = jnp.maximum(e + shifts_ref[0:1, :], 0.0)

    # looking_model.forward_first_stage: w1 -> BN(eval) -> ReLU -> Dropout(eval)
    k = jnp.dot(kp_ref[...], w1_ref[...], preferred_element_type=f32)
    k = jnp.maximum(k + shifts_ref[1:2, :], 0.0)

    # early fusion
    y = e + k

    # Looking_early_module: 3 residual blocks of (Linear -> BN -> ReLU -> Dropout) x 2
    for s in range(NUM_STAGE):
        r0 = 2 + 2 * s
        h = jnp.dot(y.astype(bf16), stage_w_ref[2 * s], preferred_element_type=f32)
        h = jnp.maximum(h + shifts_ref[r0:r0 + 1, :], 0.0)
        h = jnp.dot(h.astype(bf16), stage_w_ref[2 * s + 1], preferred_element_type=f32)
        h = jnp.maximum(h + shifts_ref[r0 + 1:r0 + 2, :], 0.0)
        y = y + h

    # w2 (N=1) as a VPU multiply + lane reduction (avoids a lane-sparse MXU pass), then sigmoid
    logit = jnp.sum(y * w2_ref[...], axis=-1, keepdims=True) + b2_ref[0, 0]
    out_ref[...] = 1.0 / (1.0 + jnp.exp(-logit))


# -----------------------------------------------------------------------------
# Parameters: synthetic "module" params + host-side folding for the kernel
# -----------------------------------------------------------------------------
def make_raw_params(key):
    """Synthetic parameters in the original (unfolded) module form."""
    ks = iter(jax.random.split(key, 64))

    def nrm(shape, s=0.05):
        return s * jax.random.normal(next(ks), shape, dtype=jnp.float32)

    def bn(n):
        return dict(gamma=1.0 + nrm((n,), 0.1), beta=nrm((n,), 0.1),
                    mean=nrm((n,), 0.1), var=1.0 + jnp.abs(nrm((n,), 0.1)))

    p = {}
    p["w_eyes"] = nrm((EYES_FLAT, LINEAR_SIZE))            # Linear(900,256,bias=False)
    p["bn_eyes"] = bn(LINEAR_SIZE)
    p["w1"] = nrm((KP_SIZE, LINEAR_SIZE))                  # looking_model.w1
    p["b1"] = nrm((LINEAR_SIZE,))
    p["bn1"] = bn(LINEAR_SIZE)
    p["stages"] = []
    for _ in range(NUM_STAGE):
        for _ in range(2):                                  # l1, l2 per residual block
            p["stages"].append(dict(w=nrm((LINEAR_SIZE, LINEAR_SIZE)),
                                    b=nrm((LINEAR_SIZE,)), bn=bn(LINEAR_SIZE)))
    p["w2"] = nrm((LINEAR_SIZE, 1))
    p["b2"] = nrm((1, 1))
    return p


def fold_params(p):
    """Fold (Linear bias +) eval-mode BN into weight columns / shift vectors,
    pad K-dims, cast matmul weights to bf16, and pack all shifts into (8,256)."""
    bf16 = jnp.bfloat16

    def scale_shift(bn, bias=None):
        scale = bn["gamma"] / jnp.sqrt(bn["var"] + BN_EPS)
        shift = bn["beta"] - bn["mean"] * scale
        if bias is not None:
            shift = shift + bias * scale
        return scale, shift

    f = {}
    se, she = scale_shift(p["bn_eyes"])
    w_eyes = p["w_eyes"] * se[None, :]
    f["w_eyes"] = jnp.pad(w_eyes, ((0, EYES_PAD - EYES_FLAT), (0, 0))).astype(bf16)

    s1, sh1 = scale_shift(p["bn1"], p["b1"])
    w1 = p["w1"] * s1[None, :]
    f["w1"] = jnp.pad(w1, ((0, KP_PAD - KP_SIZE), (0, 0))).astype(bf16)

    ws, shs = [], []
    for layer in p["stages"]:
        s, sh = scale_shift(layer["bn"], layer["b"])
        ws.append((layer["w"] * s[None, :]).astype(bf16))
        shs.append(sh)
    f["stage_w"] = jnp.stack(ws)                                   # (6, 256, 256) bf16

    # Packed shift rows: [she, sh1, stage0.l1, stage0.l2, ..., stage2.l2] -> (8, 256) f32
    f["shifts"] = jnp.stack([she, sh1] + shs).astype(jnp.float32)

    f["w2_row"] = p["w2"].reshape(1, -1)                           # (1, 256) f32
    f["b2"] = p["b2"].reshape(1, 1)                                # (1, 1)   f32 (SMEM)
    return f


# -----------------------------------------------------------------------------
# Wrapper
# -----------------------------------------------------------------------------
@jax.jit
def looking_forward(eyes_nchw, keypoint, fp):
    B = eyes_nchw.shape[0]
    eyes = eyes_nchw.reshape(B, -1)                                  # nn.Flatten()
    eyes = jnp.pad(eyes, ((0, 0), (0, EYES_PAD - EYES_FLAT)))
    kp = jnp.pad(keypoint, ((0, 0), (0, KP_PAD - KP_SIZE)))

    # batch tiling (pad batch to a multiple of the tile)
    tb = BATCH_TILE if B >= BATCH_TILE else max(8, ((B + 7) // 8) * 8)
    b_pad = ((B + tb - 1) // tb) * tb
    if b_pad != B:
        eyes = jnp.pad(eyes, ((0, b_pad - B), (0, 0)))
        kp = jnp.pad(kp, ((0, b_pad - B), (0, 0)))
    eyes = eyes.astype(jnp.bfloat16)
    kp = kp.astype(jnp.bfloat16)

    const2 = lambda i: (0, 0)
    const3 = lambda i: (0, 0, 0)

    out = pl.pallas_call(
        _looking_fused_kernel,
        out_shape=jax.ShapeDtypeStruct((b_pad, 1), jnp.float32),
        grid=(b_pad // tb,),
        in_specs=[
            pl.BlockSpec((tb, EYES_PAD), lambda i: (i, 0)),                    # eyes tile
            pl.BlockSpec((tb, KP_PAD), lambda i: (i, 0)),                      # kp tile
            pl.BlockSpec((EYES_PAD, LINEAR_SIZE), const2),                     # weights stay
            pl.BlockSpec((KP_PAD, LINEAR_SIZE), const2),                       # VMEM-resident
            pl.BlockSpec((2 * NUM_STAGE, LINEAR_SIZE, LINEAR_SIZE), const3),   # across grid
            pl.BlockSpec((2 + 2 * NUM_STAGE, LINEAR_SIZE), const2),            # packed shifts
            pl.BlockSpec((1, LINEAR_SIZE), const2),                            # w2 row
            pl.BlockSpec(memory_space=pltpu.MemorySpace.SMEM),                 # b2 scalar
        ],
        out_specs=pl.BlockSpec((tb, 1), lambda i: (i, 0)),
        compiler_params=pltpu.CompilerParams(
            dimension_semantics=("parallel",),
            vmem_limit_bytes=32 * 1024 * 1024),
    )(eyes, kp, fp["w_eyes"], fp["w1"], fp["stage_w"], fp["shifts"],
      fp["w2_row"], fp["b2"])
    return out[:B]


# -----------------------------------------------------------------------------
# Pure-JAX references
# -----------------------------------------------------------------------------
def looking_forward_folded_ref(eyes_nchw, keypoint, f):
    """Mirror of the kernel math (folded params, bf16 dots) — tight check."""
    bf16 = jnp.bfloat16
    f32 = jnp.float32
    B = eyes_nchw.shape[0]
    eyes = jnp.pad(eyes_nchw.reshape(B, -1), ((0, 0), (0, EYES_PAD - EYES_FLAT))).astype(bf16)
    kp = jnp.pad(keypoint, ((0, 0), (0, KP_PAD - KP_SIZE))).astype(bf16)

    e = jnp.maximum(jnp.dot(eyes, f["w_eyes"], preferred_element_type=f32)
                    + f["shifts"][0:1, :], 0.0)
    k = jnp.maximum(jnp.dot(kp, f["w1"], preferred_element_type=f32)
                    + f["shifts"][1:2, :], 0.0)
    y = e + k
    for s in range(NUM_STAGE):
        r0 = 2 + 2 * s
        h = jnp.maximum(jnp.dot(y.astype(bf16), f["stage_w"][2 * s],
                                preferred_element_type=f32) + f["shifts"][r0:r0 + 1, :], 0.0)
        h = jnp.maximum(jnp.dot(h.astype(bf16), f["stage_w"][2 * s + 1],
                                preferred_element_type=f32) + f["shifts"][r0 + 1:r0 + 2, :], 0.0)
        y = y + h
    logit = jnp.sum(y * f["w2_row"], axis=-1, keepdims=True) + f["b2"][0, 0]
    return jax.nn.sigmoid(logit)


def looking_forward_module_ref(eyes_nchw, keypoint, p):
    """Full-f32, unfolded, eval-mode module semantics — loose check (bf16 weights in kernel)."""
    def bn(z, b):
        return (z - b["mean"]) / jnp.sqrt(b["var"] + BN_EPS) * b["gamma"] + b["beta"]

    B = eyes_nchw.shape[0]
    eyes = eyes_nchw.reshape(B, -1).astype(jnp.float32)
    kp = keypoint.astype(jnp.float32)

    e = jnp.maximum(bn(eyes @ p["w_eyes"], p["bn_eyes"]), 0.0)
    k = jnp.maximum(bn(kp @ p["w1"] + p["b1"], p["bn1"]), 0.0)
    y = k + e
    for s in range(NUM_STAGE):
        l1, l2 = p["stages"][2 * s], p["stages"][2 * s + 1]
        h = jnp.maximum(bn(y @ l1["w"] + l1["b"], l1["bn"]), 0.0)
        h = jnp.maximum(bn(h @ l2["w"] + l2["b"], l2["bn"]), 0.0)
        y = y + h
    return jax.nn.sigmoid(y @ p["w2"] + p["b2"])


if __name__ == "__main__":
    key = jax.random.PRNGKey(0)
    k_eyes, k_kp, k_par = jax.random.split(key, 3)

    B = 8
    eyes = jax.random.normal(k_eyes, (B, 1, 30, 30), dtype=jnp.float32)   # NCHW -> flattens to 900
    keypoint = jax.random.normal(k_kp, (B, KP_SIZE), dtype=jnp.float32)

    raw = make_raw_params(k_par)
    folded = fold_params(raw)

    out = jax.block_until_ready(looking_forward(eyes, keypoint, folded))
    assert out.shape == (B, 1) and out.dtype == jnp.float32

    # Tight check against a pure-JAX mirror of the folded bf16 computation.
    ref_folded = looking_forward_folded_ref(eyes, keypoint, folded)
    assert jnp.allclose(out, ref_folded, atol=2e-3, rtol=2e-3), (out, ref_folded)

    # Semantic check against the full-f32 eval-mode module reference.
    ref_module = looking_forward_module_ref(eyes, keypoint, raw)
    assert jnp.allclose(out, ref_module, atol=3e-2, rtol=3e-2), (out, ref_module)

    print("KERNEL_OK")
</pallas_src>

<mosaic_0001>
module attributes {stable_mosaic.version = 11 : i64} {
  func.func @_looking_fused_kernel(%arg0: i32, %arg1: memref<8x1024xbf16, #tpu.memory_space<vmem>>, %arg2: memref<8x128xbf16, #tpu.memory_space<vmem>>, %arg3: memref<1024x256xbf16, #tpu.memory_space<vmem>>, %arg4: memref<128x256xbf16, #tpu.memory_space<vmem>>, %arg5: memref<6x256x256xbf16, #tpu.memory_space<vmem>>, %arg6: memref<8x256xf32, #tpu.memory_space<vmem>>, %arg7: memref<1x256xf32, #tpu.memory_space<vmem>>, %arg8: memref<1x1xf32, #tpu.memory_space<smem>>, %arg9: memref<8x1xf32, #tpu.memory_space<vmem>>) attributes {dimension_semantics = [#tpu.dimension_semantics<parallel>], iteration_bounds = array<i64: 1>, scalar_prefetch = 0 : i64, scratch_operands = 0 : i64, tpu.core_type = #tpu.core_type<tc>, window_params = [{transform_indices = @transform_0, window_bounds = array<i64: 8, 1024>}, {transform_indices = @transform_1, window_bounds = array<i64: 8, 128>}, {pipeline_mode = #tpu.pipeline_mode<synchronous>, transform_indices = @transform_2, window_bounds = array<i64: 1024, 256>}, {pipeline_mode = #tpu.pipeline_mode<synchronous>, transform_indices = @transform_3, window_bounds = array<i64: 128, 256>}, {pipeline_mode = #tpu.pipeline_mode<synchronous>, transform_indices = @transform_4, window_bounds = array<i64: 6, 256, 256>}, {pipeline_mode = #tpu.pipeline_mode<synchronous>, transform_indices = @transform_5, window_bounds = array<i64: 8, 256>}, {pipeline_mode = #tpu.pipeline_mode<synchronous>, transform_indices = @transform_6, window_bounds = array<i64: 1, 256>}, {transform_indices = @transform_7, window_bounds = array<i64: 1, 1>}, {transform_indices = @transform_8, window_bounds = array<i64: 8, 1>}]} {
    %c0 = arith.constant 0 : index
    %c0_0 = arith.constant 0 : index
    %0 = vector.load %arg1[%c0, %c0_0] : memref<8x1024xbf16, #tpu.memory_space<vmem>>, vector<8x1024xbf16>
    %c0_1 = arith.constant 0 : index
    %c0_2 = arith.constant 0 : index
    %1 = vector.load %arg3[%c0_1, %c0_2] : memref<1024x256xbf16, #tpu.memory_space<vmem>>, vector<1024x256xbf16>
    %cst = arith.constant dense<0.000000e+00> : vector<8x256xf32>
    %2 = tpu.matmul %0, %1, %cst {dimension_numbers = #tpu.dot_dimension_numbers<[1], [0], [0], [1], [0, 0, 1, 1], [], []>} : vector<8x1024xbf16>, vector<1024x256xbf16>, vector<8x256xf32> -> vector<8x256xf32>
    %c0_3 = arith.constant 0 : index
    %c0_4 = arith.constant 0 : index
    %3 = vector.load %arg6[%c0_3, %c0_4] : memref<8x256xf32, #tpu.memory_space<vmem>>, vector<1x256xf32>
    %4 = vector.broadcast %3 : vector<1x256xf32> to vector<8x256xf32>
    %5 = arith.addf %2, %4 : vector<8x256xf32>
    %cst_5 = arith.constant 0.000000e+00 : f32
    %6 = vector.broadcast %cst_5 : f32 to vector<8x256xf32>
    %7 = arith.maximumf %5, %6 : vector<8x256xf32>
    %c0_6 = arith.constant 0 : index
    %c0_7 = arith.constant 0 : index
    %8 = vector.load %arg2[%c0_6, %c0_7] : memref<8x128xbf16, #tpu.memory_space<vmem>>, vector<8x128xbf16>
    %c0_8 = arith.constant 0 : index
    %c0_9 = arith.constant 0 : index
    %9 = vector.load %arg4[%c0_8, %c0_9] : memref<128x256xbf16, #tpu.memory_space<vmem>>, vector<128x256xbf16>
    %cst_10 = arith.constant dense<0.000000e+00> : vector<8x256xf32>
    %10 = tpu.matmul %8, %9, %cst_10 {dimension_numbers = #tpu.dot_dimension_numbers<[1], [0], [0], [1], [0, 0, 1, 1], [], []>} : vector<8x128xbf16>, vector<128x256xbf16>, vector<8x256xf32> -> vector<8x256xf32>
    %c1 = arith.constant 1 : index
    %c0_11 = arith.constant 0 : index
    %11 = vector.load %arg6[%c1, %c0_11] : memref<8x256xf32, #tpu.memory_space<vmem>>, vector<1x256xf32>
    %12 = vector.broadcast %11 : vector<1x256xf32> to vector<8x256xf32>
    %13 = arith.addf %10, %12 : vector<8x256xf32>
    %cst_12 = arith.constant 0.000000e+00 : f32
    %14 = vector.broadcast %cst_12 : f32 to vector<8x256xf32>
    %15 = arith.maximumf %13, %14 : vector<8x256xf32>
    %16 = arith.addf %7, %15 : vector<8x256xf32>
    %17 = arith.truncf %16 : vector<8x256xf32> to vector<8x256xbf16>
    %c0_13 = arith.constant 0 : index
    %c0_14 = arith.constant 0 : index
    %c0_15 = arith.constant 0 : index
    %18 = vector.load %arg5[%c0_13, %c0_14, %c0_15] : memref<6x256x256xbf16, #tpu.memory_space<vmem>>, vector<1x256x256xbf16>
    %19 = vector.shape_cast %18 : vector<1x256x256xbf16> to vector<256x256xbf16>
    %cst_16 = arith.constant dense<0.000000e+00> : vector<8x256xf32>
    %20 = tpu.matmul %17, %19, %cst_16 {dimension_numbers = #tpu.dot_dimension_numbers<[1], [0], [0], [1], [0, 0, 1, 1], [], []>} : vector<8x256xbf16>, vector<256x256xbf16>, vector<8x256xf32> -> vector<8x256xf32>
    %c2 = arith.constant 2 : index
    %c0_17 = arith.constant 0 : index
    %21 = vector.load %arg6[%c2, %c0_17] : memref<8x256xf32, #tpu.memory_space<vmem>>, vector<1x256xf32>
    %22 = vector.broadcast %21 : vector<1x256xf32> to vector<8x256xf32>
    %23 = arith.addf %20, %22 : vector<8x256xf32>
    %cst_18 = arith.constant 0.000000e+00 : f32
    %24 = vector.broadcast %cst_18 : f32 to vector<8x256xf32>
    %25 = arith.maximumf %23, %24 : vector<8x256xf32>
    %26 = arith.truncf %25 : vector<8x256xf32> to vector<8x256xbf16>
    %c1_19 = arith.constant 1 : index
    %c0_20 = arith.constant 0 : index
    %c0_21 = arith.constant 0 : index
    %27 = vector.load %arg5[%c1_19, %c0_20, %c0_21] : memref<6x256x256xbf16, #tpu.memory_space<vmem>>, vector<1x256x256xbf16>
    %28 = vector.shape_cast %27 : vector<1x256x256xbf16> to vector<256x256xbf16>
    %cst_22 = arith.constant dense<0.000000e+00> : vector<8x256xf32>
    %29 = tpu.matmul %26, %28, %cst_22 {dimension_numbers = #tpu.dot_dimension_numbers<[1], [0], [0], [1], [0, 0, 1, 1], [], []>} : vector<8x256xbf16>, vector<256x256xbf16>, vector<8x256xf32> -> vector<8x256xf32>
    %c3 = arith.constant 3 : index
    %c0_23 = arith.constant 0 : index
    %30 = vector.load %arg6[%c3, %c0_23] : memref<8x256xf32, #tpu.memory_space<vmem>>, vector<1x256xf32>
    %31 = vector.broadcast %30 : vector<1x256xf32> to vector<8x256xf32>
    %32 = arith.addf %29, %31 : vector<8x256xf32>
    %cst_24 = arith.constant 0.000000e+00 : f32
    %33 = vector.broadcast %cst_24 : f32 to vector<8x256xf32>
    %34 = arith.maximumf %32, %33 : vector<8x256xf32>
    %35 = arith.addf %16, %34 : vector<8x256xf32>
    %36 = arith.truncf %35 : vector<8x256xf32> to vector<8x256xbf16>
    %c2_25 = arith.constant 2 : index
    %c0_26 = arith.constant 0 : index
    %c0_27 = arith.constant 0 : index
    %37 = vector.load %arg5[%c2_25, %c0_26, %c0_27] : memref<6x256x256xbf16, #tpu.memory_space<vmem>>, vector<1x256x256xbf16>
    %38 = vector.shape_cast %37 : vector<1x256x256xbf16> to vector<256x256xbf16>
    %cst_28 = arith.constant dense<0.000000e+00> : vector<8x256xf32>
    %39 = tpu.matmul %36, %38, %cst_28 {dimension_numbers = #tpu.dot_dimension_numbers<[1], [0], [0], [1], [0, 0, 1, 1], [], []>} : vector<8x256xbf16>, vector<256x256xbf16>, vector<8x256xf32> -> vector<8x256xf32>
    %c4 = arith.constant 4 : index
    %c0_29 = arith.constant 0 : index
    %40 = vector.load %arg6[%c4, %c0_29] : memref<8x256xf32, #tpu.memory_space<vmem>>, vector<1x256xf32>
    %41 = vector.broadcast %40 : vector<1x256xf32> to vector<8x256xf32>
    %42 = arith.addf %39, %41 : vector<8x256xf32>
    %cst_30 = arith.constant 0.000000e+00 : f32
    %43 = vector.broadcast %cst_30 : f32 to vector<8x256xf32>
    %44 = arith.maximumf %42, %43 : vector<8x256xf32>
    %45 = arith.truncf %44 : vector<8x256xf32> to vector<8x256xbf16>
    %c3_31 = arith.constant 3 : index
    %c0_32 = arith.constant 0 : index
    %c0_33 = arith.constant 0 : index
    %46 = vector.load %arg5[%c3_31, %c0_32, %c0_33] : memref<6x256x256xbf16, #tpu.memory_space<vmem>>, vector<1x256x256xbf16>
    %47 = vector.shape_cast %46 : vector<1x256x256xbf16> to vector<256x256xbf16>
    %cst_34 = arith.constant dense<0.000000e+00> : vector<8x256xf32>
    %48 = tpu.matmul %45, %47, %cst_34 {dimension_numbers = #tpu.dot_dimension_numbers<[1], [0], [0], [1], [0, 0, 1, 1], [], []>} : vector<8x256xbf16>, vector<256x256xbf16>, vector<8x256xf32> -> vector<8x256xf32>
    %c5 = arith.constant 5 : index
    %c0_35 = arith.constant 0 : index
    %49 = vector.load %arg6[%c5, %c0_35] : memref<8x256xf32, #tpu.memory_space<vmem>>, vector<1x256xf32>
    %50 = vector.broadcast %49 : vector<1x256xf32> to vector<8x256xf32>
    %51 = arith.addf %48, %50 : vector<8x256xf32>
    %cst_36 = arith.constant 0.000000e+00 : f32
    %52 = vector.broadcast %cst_36 : f32 to vector<8x256xf32>
    %53 = arith.maximumf %51, %52 : vector<8x256xf32>
    %54 = arith.addf %35, %53 : vector<8x256xf32>
    %55 = arith.truncf %54 : vector<8x256xf32> to vector<8x256xbf16>
    %c4_37 = arith.constant 4 : index
    %c0_38 = arith.constant 0 : index
    %c0_39 = arith.constant 0 : index
    %56 = vector.load %arg5[%c4_37, %c0_38, %c0_39] : memref<6x256x256xbf16, #tpu.memory_space<vmem>>, vector<1x256x256xbf16>
    %57 = vector.shape_cast %56 : vector<1x256x256xbf16> to vector<256x256xbf16>
    %cst_40 = arith.constant dense<0.000000e+00> : vector<8x256xf32>
    %58 = tpu.matmul %55, %57, %cst_40 {dimension_numbers = #tpu.dot_dimension_numbers<[1], [0], [0], [1], [0, 0, 1, 1], [], []>} : vector<8x256xbf16>, vector<256x256xbf16>, vector<8x256xf32> -> vector<8x256xf32>
    %c6 = arith.constant 6 : index
    %c0_41 = arith.constant 0 : index
    %59 = vector.load %arg6[%c6, %c0_41] : memref<8x256xf32, #tpu.memory_space<vmem>>, vector<1x256xf32>
    %60 = vector.broadcast %59 : vector<1x256xf32> to vector<8x256xf32>
    %61 = arith.addf %58, %60 : vector<8x256xf32>
    %cst_42 = arith.constant 0.000000e+00 : f32
    %62 = vector.broadcast %cst_42 : f32 to vector<8x256xf32>
    %63 = arith.maximumf %61, %62 : vector<8x256xf32>
    %64 = arith.truncf %63 : vector<8x256xf32> to vector<8x256xbf16>
    %c5_43 = arith.constant 5 : index
    %c0_44 = arith.constant 0 : index
    %c0_45 = arith.constant 0 : index
    %65 = vector.load %arg5[%c5_43, %c0_44, %c0_45] : memref<6x256x256xbf16, #tpu.memory_space<vmem>>, vector<1x256x256xbf16>
    %66 = vector.shape_cast %65 : vector<1x256x256xbf16> to vector<256x256xbf16>
    %cst_46 = arith.constant dense<0.000000e+00> : vector<8x256xf32>
    %67 = tpu.matmul %64, %66, %cst_46 {dimension_numbers = #tpu.dot_dimension_numbers<[1], [0], [0], [1], [0, 0, 1, 1], [], []>} : vector<8x256xbf16>, vector<256x256xbf16>, vector<8x256xf32> -> vector<8x256xf32>
    %c7 = arith.constant 7 : index
    %c0_47 = arith.constant 0 : index
    %68 = vector.load %arg6[%c7, %c0_47] : memref<8x256xf32, #tpu.memory_space<vmem>>, vector<1x256xf32>
    %69 = vector.broadcast %68 : vector<1x256xf32> to vector<8x256xf32>
    %70 = arith.addf %67, %69 : vector<8x256xf32>
    %cst_48 = arith.constant 0.000000e+00 : f32
    %71 = vector.broadcast %cst_48 : f32 to vector<8x256xf32>
    %72 = arith.maximumf %70, %71 : vector<8x256xf32>
    %73 = arith.addf %54, %72 : vector<8x256xf32>
    %c0_49 = arith.constant 0 : index
    %c0_50 = arith.constant 0 : index
    %74 = vector.load %arg7[%c0_49, %c0_50] : memref<1x256xf32, #tpu.memory_space<vmem>>, vector<1x256xf32>
    %75 = vector.broadcast %74 : vector<1x256xf32> to vector<8x256xf32>
    %76 = arith.mulf %73, %75 : vector<8x256xf32>
    %cst_51 = arith.constant dense<0.000000e+00> : vector<8xf32>
    %77 = vector.multi_reduction <add>, %76, %cst_51 [1] : vector<8x256xf32> to vector<8xf32>
    %78 = vector.shape_cast %77 : vector<8xf32> to vector<8x1xf32>
    %c0_52 = arith.constant 0 : index
    %c0_53 = arith.constant 0 : index
    %79 = memref.load %arg8[%c0_52, %c0_53] : memref<1x1xf32, #tpu.memory_space<smem>>
    %80 = vector.broadcast %79 : f32 to vector<8x1xf32>
    %81 = arith.addf %78, %80 : vector<8x1xf32>
    %cst_54 = arith.constant 0.000000e+00 : f32
    %82 = vector.broadcast %cst_54 : f32 to vector<8x1xf32>
    %83 = arith.subf %82, %81 : vector<8x1xf32>
    %84 = math.exp %83 : vector<8x1xf32>
    %cst_55 = arith.constant 1.000000e+00 : f32
    %85 = vector.broadcast %cst_55 : f32 to vector<8x1xf32>
    %86 = arith.addf %85, %84 : vector<8x1xf32>
    %cst_56 = arith.constant 1.000000e+00 : f32
    %87 = vector.broadcast %cst_56 : f32 to vector<8x1xf32>
    %88 = arith.divf %87, %86 : vector<8x1xf32>
    %c0_57 = arith.constant 0 : index
    %c0_58 = arith.constant 0 : index
    %89 = vector.load %arg9[%c0_57, %c0_58] : memref<8x1xf32, #tpu.memory_space<vmem>>, vector<8x1xf32>
    tpu.vector_store %arg9[%c0_57, %c0_58], %88 {strides = array<i32>} : memref<8x1xf32, #tpu.memory_space<vmem>>, vector<8x1xf32>,
    return
  }
  func.func @transform_0(%arg0: i32) -> (i32, i32) {
    %c0_i32 = arith.constant 0 : i32
    %c0_i32_0 = arith.constant 0 : i32
    return %arg0, %c0_i32 : i32, i32
  }
  func.func @transform_1(%arg0: i32) -> (i32, i32) {
    %c0_i32 = arith.constant 0 : i32
    %c0_i32_0 = arith.constant 0 : i32
    return %arg0, %c0_i32 : i32, i32
  }
  func.func @transform_2(%arg0: i32) -> (i32, i32) {
    %c0_i32 = arith.constant 0 : i32
    %c0_i32_0 = arith.constant 0 : i32
    %c0_i32_1 = arith.constant 0 : i32
    return %c0_i32, %c0_i32_0 : i32, i32
  }
  func.func @transform_3(%arg0: i32) -> (i32, i32) {
    %c0_i32 = arith.constant 0 : i32
    %c0_i32_0 = arith.constant 0 : i32
    %c0_i32_1 = arith.constant 0 : i32
    return %c0_i32, %c0_i32_0 : i32, i32
  }
  func.func @transform_4(%arg0: i32) -> (i32, i32, i32) {
    %c0_i32 = arith.constant 0 : i32
    %c0_i32_0 = arith.constant 0 : i32
    %c0_i32_1 = arith.constant 0 : i32
    %c0_i32_2 = arith.constant 0 : i32
    return %c0_i32, %c0_i32_0, %c0_i32_1 : i32, i32, i32
  }
  func.func @transform_5(%arg0: i32) -> (i32, i32) {
    %c0_i32 = arith.constant 0 : i32
    %c0_i32_0 = arith.constant 0 : i32
    %c0_i32_1 = arith.constant 0 : i32
    return %c0_i32, %c0_i32_0 : i32, i32
  }
  func.func @transform_6(%arg0: i32) -> (i32, i32) {
    %c0_i32 = arith.constant 0 : i32
    %c0_i32_0 = arith.constant 0 : i32
    %c0_i32_1 = arith.constant 0 : i32
    return %c0_i32, %c0_i32_0 : i32, i32
  }
  func.func @transform_7(%arg0: i32) -> (i32, i32) {
    %c0_i32 = arith.constant 0 : i32
    %c0_i32_0 = arith.constant 0 : i32
    %c0_i32_1 = arith.constant 0 : i32
    return %c0_i32, %c0_i32_0 : i32, i32
  }
  func.func @transform_8(%arg0: i32) -> (i32, i32) {
    %c0_i32 = arith.constant 0 : i32
    %c0_i32_0 = arith.constant 0 : i32
    return %arg0, %c0_i32 : i32, i32
  }
}

</mosaic_0001>

<bundles_post_ra>
// kernel: looking_forward.1
= control target key start
LH: loop header
LB: loop body
LE: loop exit
PB: predicated region body
PF: predicated region fallthrough
CT: control target
= control target key end

     0   :  { %14 = vsyncpa [#allocation4], 0  ;;  %s3901_s0 = inlined_call_operand.vmem [shape: bf16[8,1024], index: 0, kind: input, shape index: {}]   ;;  %s3902_s1 = inlined_call_operand.vmem [shape: bf16[8,128], index: 1, kind: input, shape index: {}]   ;;  %s3903_s2 = inlined_call_operand.hbm [shape: bf16[1024,256], index: 2, kind: input, shape index: {}]   ;;  %s3904_s3 = inlined_call_operand.vmem [shape: bf16[128,256], index: 3, kind: input, shape index: {}]   ;;  %s3905_s4 = inlined_call_operand.hbm [shape: bf16[6,256,256], index: 4, kind: input, shape index: {}]   ;;  %s3906_s5 = inlined_call_operand.vmem [shape: f32[8,256], index: 5, kind: input, shape index: {}]   ;;  %s3907_s6 = inlined_call_operand.vmem [shape: f32[1,256], index: 6, kind: input, shape index: {}]   ;;  %s3908_s7 = inlined_call_operand.<no memory space> [shape: f32[1,1], index: 7, kind: input, shape index: {}]   ;;  %s3909_s8 = inlined_call_operand.vmem [shape: f32[8,1], index: 8, kind: output, shape index: {}]  }
   0x1   :  { %15 = vsyncpa [#allocation6], 0  ;;  %s3671_s27 = smov [#allocation3]   ;;  %s3623_s9 = scalar_lea.hbm %s3903_s2, 16384 }
   0x2   :  { %s25_s28 = sshll.u32 %s3671_s27, 4  ;;  %p3624_p0 = scmp.ne.s32.totalorder %s3903_s2, %s3623_s9  ;;  %s26_s28 = int_to_ptr.vmem [resolvable:$true] %s25_s28 }
   0x3   :  { %p3627_p1 = scmp.lt.u32.totalorder %s3623_s9, %s3903_s2 }
   0x5   :  { %p3629_p2 = pnand %p3627_p1, %p3624_p0 }
   0x7   :  { %3632 = shalt.err (!%p3629_p2)
}
   0x8   :  { %s3633_s14 = scalar_lea.vmem %s26_s28, 16384  ;;  %p3638_p4 = scmp.lt.s32.totalorder %s26_s28, %s26_s28 }
   0x9   :  { %p3634_p3 = scmp.ne.s32.totalorder %s26_s28, %s3633_s14  ;;  %p3639_p5 = scmp.lt.s32.totalorder %s3633_s14, %s3633_s14 }
   0xb   :  { %p3640_p6 = por %p3639_p5, %p3638_p4 }
   0xd   :  { %p3641_p7 = pnand %p3640_p6, %p3634_p3 }
   0xf   :  { %3644 = shalt.err (!%p3641_p7)
}
  0x10   :  { %s3672_s15 = smov 128   ;;  %s3673_s16 = smov 8  }
  0x11   :  { %31 = dma.hbm_to_vmem [thread:$0]  %s3903_s2, 16384, %s26_s28, [#allocation4], %s3672_s15, %s3672_s15, %s3673_s16  }
  0x12   :  { %s3674_s19 = smov [#allocation5]   ;;  %s3645_s23 = scalar_lea.hbm %s3905_s4, 24576 }
  0x13   :  { %s39_s20 = sshll.u32 %s3674_s19, 4  ;;  %p3646_p8 = scmp.ne.s32.totalorder %s3905_s4, %s3645_s23  ;;  %s40_s20 = int_to_ptr.vmem [resolvable:$true] %s39_s20 }
  0x14   :  { %p3649_p9 = scmp.lt.u32.totalorder %s3645_s23, %s3905_s4 }
  0x16   :  { %p3651_p10 = pnand %p3649_p9, %p3646_p8 }
  0x18   :  { %3654 = shalt.err (!%p3651_p10)
}
  0x19   :  { %s3655_s29 = scalar_lea.vmem %s40_s20, 24576  ;;  %p3660_p12 = scmp.lt.s32.totalorder %s40_s20, %s40_s20 }
  0x1a   :  { %p3656_p11 = scmp.ne.s32.totalorder %s40_s20, %s3655_s29  ;;  %p3661_p13 = scmp.lt.s32.totalorder %s3655_s29, %s3655_s29 }
  0x1c   :  { %p3662_p0 = por %p3661_p13, %p3660_p12 }
  0x1e   :  { %p3663_p1 = pnand %p3662_p0, %p3656_p11 }
  0x20   :  { %3666 = shalt.err (!%p3663_p1)
}
  0x21   :  { %45 = dma.hbm_to_vmem [thread:$0]  %s3905_s4, 24576, %s40_s20, [#allocation6], %s3672_s15, %s3672_s15, %s3673_s16  }
  0x22   :  { %3667 = dma.done.wait [#allocation4], 16384  }
  0x23   :  { %3668 = vsyncadd [#allocation4], 4294950912 }
  0x24   :  { %3669 = dma.done.wait [#allocation6], 24576  }
  0x25   :  { %3670 = vsyncadd [#allocation6], 4294942720  ;;  %v3107_v0 = vld [vmem:[#allocation3 + $0x4] ss:$8 sps:$4 sm:$0xff]   ;;  %v3109_v1 = vld [vmem:[#allocation3] ss:$8 sps:$4 sm:$0xff]  }
  0x26   :  { %871 = vmatprep.subr.bf16.mxu0 %v3107_v0  ;;  %v3110_v2 = vld [vmem:[#allocation3 + $0x14] ss:$8 sps:$4 sm:$0xff]   ;;  %v3112_v3 = vld [vmem:[#allocation3 + $0x10] ss:$8 sps:$4 sm:$0xff]   ;;  %v3113_v4 = vld [vmem:[#allocation3 + $0x24] ss:$8 sps:$4 sm:$0xff]  }
  0x27   :  { %872 = vmatpush1.bf16.msra.mxu0 %v3109_v1  ;;  %v3115_v5 = vld [vmem:[#allocation3 + $0x20] ss:$8 sps:$4 sm:$0xff]   ;;  %v3116_v6 = vld [vmem:[#allocation3 + $0x34] ss:$8 sps:$4 sm:$0xff]   ;;  %v3118_v7 = vld [vmem:[#allocation3 + $0x30] ss:$8 sps:$4 sm:$0xff]  }
  0x28   :  { %873 = vmatprep.subr.bf16.mxu0 %v3110_v2  ;;  %v3119_v8 = vld [vmem:[#allocation3 + $0x44] ss:$8 sps:$4 sm:$0xff]   ;;  %v3121_v9 = vld [vmem:[#allocation3 + $0x40] ss:$8 sps:$4 sm:$0xff]   ;;  %v3122_v10 = vld [vmem:[#allocation3 + $0x54] ss:$8 sps:$4 sm:$0xff]  }
  0x29   :  { %v3124_v11 = vld [vmem:[#allocation3 + $0x50] ss:$8 sps:$4 sm:$0xff]   ;;  %v3125_v12 = vld [vmem:[#allocation3 + $0x64] ss:$8 sps:$4 sm:$0xff]   ;;  %v3127_v15 = vld [vmem:[#allocation3 + $0x60] ss:$8 sps:$4 sm:$0xff]  }
  0x2a   :  { %v59_v13 = vld [vmem:[%s3901_s0] sm:$0xff]  ;;  %v3128_v16 = vld [vmem:[#allocation3 + $0x74] ss:$8 sps:$4 sm:$0xff]   ;;  %v3130_v17 = vld [vmem:[#allocation3 + $0x70] ss:$8 sps:$4 sm:$0xff]   ;;  %vm2729_vm0 = vcmask 7168  }
  0x2b   :  { %874 = vmatpush1.bf16.msra.mxu0 %v3112_v3  ;;  %v2738_v14 = vcombine.high %v59_v13, %v59_v13  ;;  %v3131_v18 = vld [vmem:[#allocation3 + $0x84] ss:$8 sps:$4 sm:$0xff]   ;;  %v3133_v19 = vld [vmem:[#allocation3 + $0x80] ss:$8 sps:$4 sm:$0xff]   ;;  %v3134_v20 = vld [vmem:[#allocation3 + $0x94] ss:$8 sps:$4 sm:$0xff]   ;;  %v2737_v36 = vcombine.low %v59_v13, %v59_v13 }
  0x2c   :  { %875 = vmatprep.subr.bf16.mxu0 %v3113_v4  ;;  %v3136_v21 = vld [vmem:[#allocation3 + $0x90] ss:$8 sps:$4 sm:$0xff]   ;;  %v3137_v22 = vld [vmem:[#allocation3 + $0xa4] ss:$8 sps:$4 sm:$0xff]   ;;  %v3139_v23 = vld [vmem:[#allocation3 + $0xa0] ss:$8 sps:$4 sm:$0xff]  }
  0x2d   :  { %903 = vmatprep.mubr.bf16.mxu0 %v2738_v14  ;;  %v3140_v24 = vld [vmem:[#allocation3 + $0xb4] ss:$8 sps:$4 sm:$0xff]   ;;  %v3142_v25 = vld [vmem:[#allocation3 + $0xb0] ss:$8 sps:$4 sm:$0xff]   ;;  %v3143_v26 = vld [vmem:[#allocation3 + $0xc4] ss:$8 sps:$4 sm:$0xff]  }
  0x2e   :  { %v3145_v27 = vld [vmem:[#allocation3 + $0xc0] ss:$8 sps:$4 sm:$0xff]   ;;  %v3146_v28 = vld [vmem:[#allocation3 + $0xd4] ss:$8 sps:$4 sm:$0xff]   ;;  %v3148_v29 = vld [vmem:[#allocation3 + $0xd0] ss:$8 sps:$4 sm:$0xff]  }
  0x2f   :  { %876 = vmatpush1.bf16.msra.mxu0 %v3115_v5  ;;  %v3149_v30 = vld [vmem:[#allocation3 + $0xe4] ss:$8 sps:$4 sm:$0xff]   ;;  %v3151_v31 = vld [vmem:[#allocation3 + $0xe0] ss:$8 sps:$4 sm:$0xff]   ;;  %v3152_v32 = vld [vmem:[#allocation3 + $0xf4] ss:$8 sps:$4 sm:$0xff]  }
  0x30   :  { %877 = vmatprep.subr.bf16.mxu0 %v3116_v6  ;;  %v3154_v33 = vld [vmem:[#allocation3 + $0xf0] ss:$8 sps:$4 sm:$0xff]   ;;  %v3159_v34 = vld [vmem:[#allocation3 + $0x104] ss:$8 sps:$4 sm:$0xff]   ;;  %v3157_v37 = vld [vmem:[#allocation3 + $0x100] ss:$8 sps:$4 sm:$0xff]  }
  0x31   :  { %v3751_v35 = vld [vmem:[%s3901_s0 + $0x8] sm:$0xff]  ;;  %v3162_v39 = vld [vmem:[#allocation3 + $0x114] ss:$8 sps:$4 sm:$0xff]   ;;  %v3160_v40 = vld [vmem:[#allocation3 + $0x110] ss:$8 sps:$4 sm:$0xff]  }
  0x32   :  { %v2740_v38 = vcombine.high %v3751_v35, %v3751_v35  ;;  %v3165_v41 = vld [vmem:[#allocation3 + $0x124] ss:$8 sps:$4 sm:$0xff]   ;;  %v3163_v42 = vld [vmem:[#allocation3 + $0x120] ss:$8 sps:$4 sm:$0xff]   ;;  %v3168_v43 = vld [vmem:[#allocation3 + $0x134] ss:$8 sps:$4 sm:$0xff]  }
  0x33   :  { %878 = vmatpush1.bf16.msra.mxu0 %v3118_v7  ;;  %v3166_v44 = vld [vmem:[#allocation3 + $0x130] ss:$8 sps:$4 sm:$0xff]   ;;  %v3171_v45 = vld [vmem:[#allocation3 + $0x144] ss:$8 sps:$4 sm:$0xff]   ;;  %v3169_v46 = vld [vmem:[#allocation3 + $0x140] ss:$8 sps:$4 sm:$0xff]  }
  0x34   :  { %879 = vmatprep.subr.bf16.mxu0 %v3119_v8  ;;  %v3174_v47 = vld [vmem:[#allocation3 + $0x154] ss:$8 sps:$4 sm:$0xff]   ;;  %v3172_v48 = vld [vmem:[#allocation3 + $0x150] ss:$8 sps:$4 sm:$0xff]   ;;  %v3177_v49 = vld [vmem:[#allocation3 + $0x164] ss:$8 sps:$4 sm:$0xff]  }
  0x35   :  { %v3175_v50 = vld [vmem:[#allocation3 + $0x160] ss:$8 sps:$4 sm:$0xff]   ;;  %v3180_v51 = vld [vmem:[#allocation3 + $0x174] ss:$8 sps:$4 sm:$0xff]   ;;  %v3178_v52 = vld [vmem:[#allocation3 + $0x170] ss:$8 sps:$4 sm:$0xff]  }
  0x36   :  { %v3183_v53 = vld [vmem:[#allocation3 + $0x184] ss:$8 sps:$4 sm:$0xff]   ;;  %v3283_v55 = vld [vmem:[%s3904_s3] ss:$8 sps:$4 sm:$0xff]   ;;  %v3186_v57 = vld [vmem:[#allocation3 + $0x194] ss:$8 sps:$4 sm:$0xff]  }
  0x37   :  { %880 = vmatpush1.bf16.msra.mxu0 %v3121_v9  ;;  %v3281_v54 = vld [vmem:[%s3904_s3 + $0x4] ss:$8 sps:$4 sm:$0xff]   ;;  %v3181_v56 = vld [vmem:[#allocation3 + $0x180] ss:$8 sps:$4 sm:$0xff]   ;;  %v3287_v58 = vld [vmem:[%s3904_s3 + $0x14] ss:$8 sps:$4 sm:$0xff]  }
  0x38   :  { %881 = vmatprep.subr.bf16.mxu0 %v3122_v10  ;;  %1147 = vmatprep.subr.bf16.mxu1 %v3281_v54  ;;  %v3289_v59 = vld [vmem:[%s3904_s3 + $0x10] ss:$8 sps:$4 sm:$0xff]   ;;  %v3189_v61 = vld [vmem:[#allocation3 + $0x1a4] ss:$8 sps:$4 sm:$0xff]   ;;  %v3295_v63 = vld [vmem:[%s3904_s3 + $0x20] ss:$8 sps:$4 sm:$0xff]  }
  0x39   :  { %1148 = vmatpush1.bf16.msra.mxu1 %v3283_v55  ;;  %v3184_v60 = vld [vmem:[#allocation3 + $0x190] ss:$8 sps:$4 sm:$0xff]   ;;  %v3293_v62 = vld [vmem:[%s3904_s3 + $0x24] ss:$8 sps:$4 sm:$0xff]   ;;  %v3187_v0 = vld [vmem:[#allocation3 + $0x1a0] ss:$8 sps:$4 sm:$0xff]  }
  0x3a   :  { %1149 = vmatprep.subr.bf16.mxu1 %v3287_v58  ;;  %v3192_v1 = vld [vmem:[#allocation3 + $0x1b4] ss:$8 sps:$4 sm:$0xff]   ;;  %v3301_v3 = vld [vmem:[%s3904_s3 + $0x30] ss:$8 sps:$4 sm:$0xff]   ;;  %v3195_v5 = vld [vmem:[#allocation3 + $0x1c4] ss:$8 sps:$4 sm:$0xff]  }
  0x3b   :  { %882 = vmatpush1.bf16.msra.mxu0 %v3124_v11  ;;  %v3299_v2 = vld [vmem:[%s3904_s3 + $0x34] ss:$8 sps:$4 sm:$0xff]   ;;  %v3190_v4 = vld [vmem:[#allocation3 + $0x1b0] ss:$8 sps:$4 sm:$0xff]   ;;  %v3305_v6 = vld [vmem:[%s3904_s3 + $0x44] ss:$8 sps:$4 sm:$0xff]  }
  0x3c   :  { %883 = vmatprep.subr.bf16.mxu0 %v3125_v12  ;;  %v3307_v7 = vld [vmem:[%s3904_s3 + $0x40] ss:$8 sps:$4 sm:$0xff]   ;;  %v3198_v9 = vld [vmem:[#allocation3 + $0x1d4] ss:$8 sps:$4 sm:$0xff]   ;;  %v3313_v11 = vld [vmem:[%s3904_s3 + $0x50] ss:$8 sps:$4 sm:$0xff]  }
  0x3d   :  { %1150 = vmatpush1.bf16.msra.mxu1 %v3289_v59  ;;  %v3193_v8 = vld [vmem:[#allocation3 + $0x1c0] ss:$8 sps:$4 sm:$0xff]   ;;  %v3311_v10 = vld [vmem:[%s3904_s3 + $0x54] ss:$8 sps:$4 sm:$0xff]   ;;  %v3196_v12 = vld [vmem:[#allocation3 + $0x1d0] ss:$8 sps:$4 sm:$0xff]  }
  0x3e   :  { %1151 = vmatprep.subr.bf16.mxu1 %v3293_v62  ;;  %v3201_v13 = vld [vmem:[#allocation3 + $0x1e4] ss:$8 sps:$4 sm:$0xff]   ;;  %v3349_v54 = vld [vmem:[#allocation5 + $0x60] ss:$8 sps:$4 sm:$0xff]   ;;  %v3354_v55 = vld [vmem:[#allocation5 + $0x74] ss:$8 sps:$4 sm:$0xff]  }
  0x3f   :  { %884 = vmatpush1.bf16.msra.mxu0 %v3127_v15  ;;  %v3317_v14 = vld [vmem:[%s3904_s3 + $0x64] ss:$8 sps:$4 sm:$0xff]   ;;  %v3319_v15 = vld [vmem:[%s3904_s3 + $0x60] ss:$8 sps:$4 sm:$0xff]   ;;  %v3352_v58 = vld [vmem:[#allocation5 + $0x70] ss:$8 sps:$4 sm:$0xff]  }
  0x40   :  { %885 = vmatprep.subr.bf16.mxu0 %v3128_v16  ;;  %v3199_v16 = vld [vmem:[#allocation3 + $0x1e0] ss:$8 sps:$4 sm:$0xff]   ;;  %v3357_v59 = vld [vmem:[#allocation5 + $0x84] ss:$8 sps:$4 sm:$0xff]  }
  0x41   :  { %1152 = vmatpush1.bf16.msra.mxu1 %v3295_v63  ;;  %v3355_v62 = vld [vmem:[#allocation5 + $0x80] ss:$8 sps:$4 sm:$0xff]   ;;  %v3360_v63 = vld [vmem:[#allocation5 + $0x94] ss:$8 sps:$4 sm:$0xff]  }
  0x42   :  { %1153 = vmatprep.subr.bf16.mxu1 %v3299_v2  ;;  %v3358_v2 = vld [vmem:[#allocation5 + $0x90] ss:$8 sps:$4 sm:$0xff]  }
  0x43   :  { %886 = vmatpush1.bf16.msra.mxu0 %v3130_v17  ;;  %v3204_v17 = vld [vmem:[#allocation3 + $0x1f4] ss:$8 sps:$4 sm:$0xff]  }
  0x44   :  { %887 = vmatprep.subr.bf16.mxu0 %v3131_v18  ;;  %v3202_v18 = vld [vmem:[#allocation3 + $0x1f0] ss:$8 sps:$4 sm:$0xff]  }
  0x45   :  { %1154 = vmatpush1.bf16.msra.mxu1 %v3301_v3  ;;  %v3363_v3 = vld [vmem:[#allocation5 + $0xa4] ss:$8 sps:$4 sm:$0xff]  }
  0x46   :  { %1155 = vmatprep.subr.bf16.mxu1 %v3305_v6  ;;  %v3361_v6 = vld [vmem:[#allocation5 + $0xa0] ss:$8 sps:$4 sm:$0xff]  }
  0x47   :  { %888 = vmatpush1.bf16.msra.mxu0 %v3133_v19  ;;  %v3323_v19 = vld [vmem:[%s3904_s3 + $0x74] ss:$8 sps:$4 sm:$0xff]  }
  0x48   :  { %889 = vmatprep.subr.bf16.mxu0 %v3134_v20  ;;  %v3325_v20 = vld [vmem:[%s3904_s3 + $0x70] ss:$8 sps:$4 sm:$0xff]  }
  0x49   :  { %1156 = vmatpush1.bf16.msra.mxu1 %v3307_v7  ;;  %v3366_v7 = vld [vmem:[#allocation5 + $0xb4] ss:$8 sps:$4 sm:$0xff]  }
  0x4a   :  { %1157 = vmatprep.subr.bf16.mxu1 %v3311_v10  ;;  %v3364_v10 = vld [vmem:[#allocation5 + $0xb0] ss:$8 sps:$4 sm:$0xff]  }
  0x4b   :  { %890 = vmatpush1.bf16.msra.mxu0 %v3136_v21  ;;  %v3209_v21 = vld [vmem:[#allocation3 + $0x204] ss:$8 sps:$4 sm:$0xff]  }
  0x4c   :  { %891 = vmatprep.subr.bf16.mxu0 %v3137_v22  ;;  %v3806_v22 = vld [vmem:[%s3901_s0 + $0x10] sm:$0xff] }
  0x4d   :  { %1158 = vmatpush1.bf16.msra.mxu1 %v3313_v11  ;;  %v3369_v11 = vld [vmem:[#allocation5 + $0xc4] ss:$8 sps:$4 sm:$0xff]  }
  0x4e   :  { %1159 = vmatprep.subr.bf16.mxu1 %v3317_v14  ;;  %v3367_v14 = vld [vmem:[#allocation5 + $0xc0] ss:$8 sps:$4 sm:$0xff]  }
  0x4f   :  { %892 = vmatpush1.bf16.msra.mxu0 %v3139_v23  ;;  %v3207_v23 = vld [vmem:[#allocation3 + $0x200] ss:$8 sps:$4 sm:$0xff]  }
  0x50   :  { %893 = vmatprep.subr.bf16.mxu0 %v3140_v24  ;;  %v3675_v24 = vmov 0  }
  0x51   :  { %1160 = vmatpush1.bf16.msra.mxu1 %v3319_v15  ;;  %1179 = vmatprep.mubr.bf16.mxu1 %v3675_v24  ;;  %v3246_v15 = vld [vmem:[#allocation3 + $0x2d0] ss:$8 sps:$4 sm:$0xff]   ;;  %v3257_v24 = vld [vmem:[#allocation3 + $0x300] ss:$8 sps:$4 sm:$0xff]  }
  0x52   :  { %1161 = vmatprep.subr.bf16.mxu1 %v3323_v19  ;;  %v3252_v19 = vld [vmem:[#allocation3 + $0x2f0] ss:$8 sps:$4 sm:$0xff]  }
  0x53   :  { %894 = vmatpush1.bf16.msra.mxu0 %v3142_v25  ;;  %v2739_v25 = vcombine.low %v3751_v35, %v3751_v35  ;;  %v3339_v35 = vld [vmem:[#allocation5 + $0x24] ss:$8 sps:$4 sm:$0xff]  }
  0x54   :  { %895 = vmatprep.subr.bf16.mxu0 %v3143_v26  ;;  %v3212_v26 = vld [vmem:[#allocation3 + $0x214] ss:$8 sps:$4 sm:$0xff]  }
  0x55   :  { %1162 = vmatpush1.bf16.msra.mxu1 %v3325_v20  ;;  %v3259_v20 = vld [vmem:[#allocation3 + $0x304] ss:$8 sps:$4 sm:$0xff]  }
  0x57   :  { %896 = vmatpush1.bf16.msra.mxu0 %v3145_v27  ;;  %v1037_v27 = vld [vmem:[%s3902_s1] sm:$0xf] }
  0x58   :  { %897 = vmatprep.subr.bf16.mxu0 %v3146_v28  ;;  %v2742_v28 = vcombine.high %v3806_v22, %v3806_v22  ;;  %1180 = vmatmul.mubr.bf16.vlgmr.msra.gmra.mrb[0].mxu1 %v1037_v27  ;;  %v3260_v27 = vld [vmem:[#allocation3 + $0x310] ss:$8 sps:$4 sm:$0xff]  }
  0x5b   :  { %898 = vmatpush1.bf16.msra.mxu0 %v3148_v29  ;;  %v3331_v29 = vld [vmem:[#allocation5] ss:$8 sps:$4 sm:$0xff]  }
  0x5c   :  { %899 = vmatprep.subr.bf16.mxu0 %v3149_v30  ;;  %v3333_v30 = vld [vmem:[#allocation5 + $0x4] ss:$8 sps:$4 sm:$0xff]  }
  0x5d   :  { %1399 = vmatprep.subr.bf16.mxu1 %v3333_v30  ;;  %v3268_v30 = vld [vmem:[#allocation3 + $0x334] ss:$8 sps:$4 sm:$0xff]  }
  0x5e   :  { %1400 = vmatpush1.bf16.msra.mxu1 %v3331_v29  ;;  %v3263_v29 = vld [vmem:[#allocation3 + $0x320] ss:$8 sps:$4 sm:$0xff]  }
  0x5f   :  { %900 = vmatpush1.bf16.msra.mxu0 %v3151_v31  ;;  %v3210_v31 = vld [vmem:[#allocation3 + $0x210] ss:$8 sps:$4 sm:$0xff]  }
  0x60   :  { %901 = vmatprep.subr.bf16.mxu0 %v3152_v32  ;;  %v3336_v32 = vld [vmem:[#allocation5 + $0x14] ss:$8 sps:$4 sm:$0xff]  }
  0x61   :  { %1401 = vmatprep.subr.bf16.mxu1 %v3336_v32  ;;  %v3269_v32 = vld [vmem:[#allocation3 + $0x340] ss:$8 sps:$4 sm:$0xff]  }
  0x63   :  { %902 = vmatpush1.bf16.msra.mxu0 %v3154_v33  ;;  %v3215_v33 = vld [vmem:[#allocation3 + $0x224] ss:$8 sps:$4 sm:$0xff]  }
  0x64   :  { %912 = vmatprep.subr.bf16.mxu0 %v3159_v34  ;;  %v3334_v34 = vld [vmem:[#allocation5 + $0x10] ss:$8 sps:$4 sm:$0xff]  }
  0x65   :  { %1402 = vmatpush1.bf16.msra.mxu1 %v3334_v34  ;;  %v3272_v34 = vld [vmem:[#allocation3 + $0x350] ss:$8 sps:$4 sm:$0xff]  }
  0x66   :  { %904 = vmatmul.mubr.bf16.vlgmr.msra.gmra.mrb[0].mxu0 %v2737_v36  ;;  %v3213_v36 = vld [vmem:[#allocation3 + $0x220] ss:$8 sps:$4 sm:$0xff]   ;;  %1403 = vmatprep.subr.bf16.mxu1 %v3339_v35  ;;  %v3277_v35 = vld [vmem:[#allocation3 + $0x364] ss:$8 sps:$4 sm:$0xff]  }
  0x67   :  { %913 = vmatpush1.bf16.msra.mxu0 %v3157_v37  ;;  %944 = vmatprep.mubr.bf16.mxu0 %v2740_v38  ;;  %v3218_v37 = vld [vmem:[#allocation3 + $0x234] ss:$8 sps:$4 sm:$0xff]   ;;  %v3216_v38 = vld [vmem:[#allocation3 + $0x230] ss:$8 sps:$4 sm:$0xff]  }
  0x68   :  { %914 = vmatprep.subr.bf16.mxu0 %v3162_v39  ;;  %v3337_v39 = vld [vmem:[#allocation5 + $0x20] ss:$8 sps:$4 sm:$0xff]  }
  0x69   :  { %1404 = vmatpush1.bf16.msra.mxu1 %v3337_v39  ;;  %v3280_v39 = vld [vmem:[#allocation3 + $0x374] ss:$8 sps:$4 sm:$0xff]  }
  0x6b   :  { %915 = vmatpush1.bf16.msra.mxu0 %v3160_v40  ;;  %v3221_v40 = vld [vmem:[#allocation3 + $0x244] ss:$8 sps:$4 sm:$0xff]  }
  0x6c   :  { %916 = vmatprep.subr.bf16.mxu0 %v3165_v41  ;;  %v3342_v41 = vld [vmem:[#allocation5 + $0x34] ss:$8 sps:$4 sm:$0xff]  }
  0x6d   :  { %1405 = vmatprep.subr.bf16.mxu1 %v3342_v41  ;;  %v3286_v41 = vld [vmem:[#allocation3 + $0x384] ss:$8 sps:$4 sm:$0xff]  }
  0x6f   :  { %917 = vmatpush1.bf16.msra.mxu0 %v3163_v42  ;;  %v3340_v42 = vld [vmem:[#allocation5 + $0x30] ss:$8 sps:$4 sm:$0xff]  }
  0x70   :  { %918 = vmatprep.subr.bf16.mxu0 %v3168_v43  ;;  %v3345_v43 = vld [vmem:[#allocation5 + $0x44] ss:$8 sps:$4 sm:$0xff]   ;;  %1406 = vmatpush1.bf16.msra.mxu1 %v3340_v42  ;;  %v3284_v42 = vld [vmem:[#allocation3 + $0x380] ss:$8 sps:$4 sm:$0xff]  }
  0x71   :  { %1407 = vmatprep.subr.bf16.mxu1 %v3345_v43  ;;  %v3292_v43 = vld [vmem:[#allocation3 + $0x394] ss:$8 sps:$4 sm:$0xff]  }
  0x73   :  { %919 = vmatpush1.bf16.msra.mxu0 %v3166_v44  ;;  %v3219_v44 = vld [vmem:[#allocation3 + $0x240] ss:$8 sps:$4 sm:$0xff]  }
  0x74   :  { %920 = vmatprep.subr.bf16.mxu0 %v3171_v45  ;;  %v3224_v45 = vld [vmem:[#allocation3 + $0x254] ss:$8 sps:$4 sm:$0xff]  }
  0x77   :  { %921 = vmatpush1.bf16.msra.mxu0 %v3169_v46  ;;  %v3343_v46 = vld [vmem:[#allocation5 + $0x40] ss:$8 sps:$4 sm:$0xff]  }
  0x78   :  { %922 = vmatprep.subr.bf16.mxu0 %v3174_v47  ;;  %v3348_v47 = vld [vmem:[#allocation5 + $0x54] ss:$8 sps:$4 sm:$0xff]   ;;  %1408 = vmatpush1.bf16.msra.mxu1 %v3343_v46  ;;  %v3296_v46 = vld [vmem:[#allocation3 + $0x3a0] ss:$8 sps:$4 sm:$0xff]  }
  0x79   :  { %1409 = vmatprep.subr.bf16.mxu1 %v3348_v47  ;;  %v3304_v47 = vld [vmem:[#allocation3 + $0x3b4] ss:$8 sps:$4 sm:$0xff]  }
  0x7b   :  { %923 = vmatpush1.bf16.msra.mxu0 %v3172_v48  ;;  %v3222_v48 = vld [vmem:[#allocation3 + $0x250] ss:$8 sps:$4 sm:$0xff]  }
  0x7c   :  { %924 = vmatprep.subr.bf16.mxu0 %v3177_v49  ;;  %v3227_v49 = vld [vmem:[#allocation3 + $0x264] ss:$8 sps:$4 sm:$0xff]  }
  0x7f   :  { %925 = vmatpush1.bf16.msra.mxu0 %v3175_v50  ;;  %v3346_v50 = vld [vmem:[#allocation5 + $0x50] ss:$8 sps:$4 sm:$0xff]  }
  0x80   :  { %926 = vmatprep.subr.bf16.mxu0 %v3180_v51  ;;  %v3351_v51 = vld [vmem:[#allocation5 + $0x64] ss:$8 sps:$4 sm:$0xff]   ;;  %1410 = vmatpush1.bf16.msra.mxu1 %v3346_v50  ;;  %v3308_v50 = vld [vmem:[#allocation3 + $0x3c0] ss:$8 sps:$4 sm:$0xff]  }
  0x81   :  { %1411 = vmatprep.subr.bf16.mxu1 %v3351_v51  ;;  %v3316_v51 = vld [vmem:[#allocation3 + $0x3d4] ss:$8 sps:$4 sm:$0xff]  }
  0x83   :  { %927 = vmatpush1.bf16.msra.mxu0 %v3178_v52  ;;  %v3225_v52 = vld [vmem:[#allocation3 + $0x260] ss:$8 sps:$4 sm:$0xff]  }
  0x84   :  { %928 = vmatprep.subr.bf16.mxu0 %v3183_v53  ;;  %v3230_v53 = vld [vmem:[#allocation3 + $0x274] ss:$8 sps:$4 sm:$0xff]   ;;  %1412 = vmatpush1.bf16.msra.mxu1 %v3349_v54  ;;  %v3320_v54 = vld [vmem:[#allocation3 + $0x3e0] ss:$8 sps:$4 sm:$0xff]  }
  0x85   :  { %1413 = vmatprep.subr.bf16.mxu1 %v3354_v55  ;;  %v3328_v55 = vld [vmem:[#allocation3 + $0x3f4] ss:$8 sps:$4 sm:$0xff]  }
  0x87   :  { %929 = vmatpush1.bf16.msra.mxu0 %v3181_v56  ;;  %v3228_v56 = vld [vmem:[#allocation3 + $0x270] ss:$8 sps:$4 sm:$0xff]  }
  0x88   :  { %930 = vmatprep.subr.bf16.mxu0 %v3186_v57  ;;  %v3233_v57 = vld [vmem:[#allocation3 + $0x284] ss:$8 sps:$4 sm:$0xff]   ;;  %1414 = vmatpush1.bf16.msra.mxu1 %v3352_v58 }
  0x89   :  { %1415 = vmatprep.subr.bf16.mxu1 %v3357_v59 }
  0x8b   :  { %931 = vmatpush1.bf16.msra.mxu0 %v3184_v60  ;;  %v3231_v60 = vld [vmem:[#allocation3 + $0x280] ss:$8 sps:$4 sm:$0xff]  }
  0x8c   :  { %932 = vmatprep.subr.bf16.mxu0 %v3189_v61  ;;  %v3236_v61 = vld [vmem:[#allocation3 + $0x294] ss:$8 sps:$4 sm:$0xff]   ;;  %1416 = vmatpush1.bf16.msra.mxu1 %v3355_v62  ;;  %v3375_v62 = vld [vmem:[#allocation5 + $0xe4] ss:$8 sps:$4 sm:$0xff]  }
  0x8d   :  { %1417 = vmatprep.subr.bf16.mxu1 %v3360_v63  ;;  %v3373_v63 = vld [vmem:[#allocation5 + $0xe0] ss:$8 sps:$4 sm:$0xff]  }
  0x8f   :  { %933 = vmatpush1.bf16.msra.mxu0 %v3187_v0  ;;  %v3234_v0 = vld [vmem:[#allocation3 + $0x290] ss:$8 sps:$4 sm:$0xff]  }
  0x90   :  { %934 = vmatprep.subr.bf16.mxu0 %v3192_v1  ;;  %v3239_v1 = vld [vmem:[#allocation3 + $0x2a4] ss:$8 sps:$4 sm:$0xff]   ;;  %1418 = vmatpush1.bf16.msra.mxu1 %v3358_v2 }
  0x91   :  { %1419 = vmatprep.subr.bf16.mxu1 %v3363_v3  ;;  %v3381_v2 = vld [vmem:[#allocation5 + $0x104] ss:$8 sps:$4 sm:$0xff]   ;;  %v193_v3 = vlaneseq }
  0x93   :  { %935 = vmatpush1.bf16.msra.mxu0 %v3190_v4  ;;  %v3237_v4 = vld [vmem:[#allocation3 + $0x2a0] ss:$8 sps:$4 sm:$0xff]  }
  0x94   :  { %936 = vmatprep.subr.bf16.mxu0 %v3195_v5  ;;  %v3242_v5 = vld [vmem:[#allocation3 + $0x2b4] ss:$8 sps:$4 sm:$0xff]   ;;  %1420 = vmatpush1.bf16.msra.mxu1 %v3361_v6  ;;  %v2873_v6 = vld [vmem:[%s3906_s5 + $0x1] ss:$8 sm:$0x3] }
  0x95   :  { %1421 = vmatprep.subr.bf16.mxu1 %v3366_v7 }
  0x97   :  { %937 = vmatpush1.bf16.msra.mxu0 %v3193_v8  ;;  %v3240_v8 = vld [vmem:[#allocation3 + $0x2b0] ss:$8 sps:$4 sm:$0xff]  }
  0x98   :  { %938 = vmatprep.subr.bf16.mxu0 %v3198_v9  ;;  %v3245_v9 = vld [vmem:[#allocation3 + $0x2c4] ss:$8 sps:$4 sm:$0xff]   ;;  %1422 = vmatpush1.bf16.msra.mxu1 %v3364_v10  ;;  %v191_v10 = vld [vmem:[%s3906_s5] ss:$8 sm:$0x3] }
  0x99   :  { %1423 = vmatprep.subr.bf16.mxu1 %v3369_v11 }
  0x9b   :  { %939 = vmatpush1.bf16.msra.mxu0 %v3196_v12  ;;  %v3243_v12 = vld [vmem:[#allocation3 + $0x2c0] ss:$8 sps:$4 sm:$0xff]  }
  0x9c   :  { %940 = vmatprep.subr.bf16.mxu0 %v3201_v13  ;;  %v3248_v13 = vld [vmem:[#allocation3 + $0x2d4] ss:$8 sps:$4 sm:$0xff]   ;;  %1424 = vmatpush1.bf16.msra.mxu1 %v3367_v14 }
  0x9f   :  { %941 = vmatpush1.bf16.msra.mxu0 %v3199_v16  ;;  %v3251_v16 = vld [vmem:[#allocation3 + $0x2e4] ss:$8 sps:$4 sm:$0xff]  }
  0xa0   :  { %942 = vmatprep.subr.bf16.mxu0 %v3204_v17  ;;  %v3249_v17 = vld [vmem:[#allocation3 + $0x2e0] ss:$8 sps:$4 sm:$0xff]  }
  0xa3   :  { %943 = vmatpush1.bf16.msra.mxu0 %v3202_v18  ;;  %v3254_v18 = vld [vmem:[#allocation3 + $0x2f4] ss:$8 sps:$4 sm:$0xff]  }
  0xa4   :  { %953 = vmatprep.subr.bf16.mxu0 %v3209_v21  ;;  %v3818_v21 = vld [vmem:[%s3901_s0 + $0x18] sm:$0xff] }
  0xa6   :  { %945 = vmatmul.mubr.bf16.vlgmr.msra.gmra.mrb[0].mxu0 %v2739_v25  ;;  %v2744_v25 = vcombine.high %v3818_v21, %v3818_v21 }
  0xa7   :  { %954 = vmatpush1.bf16.msra.mxu0 %v3207_v23  ;;  %985 = vmatprep.mubr.bf16.mxu0 %v2742_v28  ;;  %v2741_v23 = vcombine.low %v3806_v22, %v3806_v22  ;;  %v3265_v28 = vld [vmem:[#allocation3 + $0x324] ss:$8 sps:$4 sm:$0xff]  }
  0xa8   :  { %955 = vmatprep.subr.bf16.mxu0 %v3212_v26  ;;  %v3262_v26 = vld [vmem:[#allocation3 + $0x314] ss:$8 sps:$4 sm:$0xff]   ;;  %v3271_v22 = vld [vmem:[#allocation3 + $0x344] ss:$8 sps:$4 sm:$0xff]  }
  0xab   :  { %956 = vmatpush1.bf16.msra.mxu0 %v3210_v31  ;;  %v3266_v31 = vld [vmem:[#allocation3 + $0x330] ss:$8 sps:$4 sm:$0xff]  }
  0xac   :  { %957 = vmatprep.subr.bf16.mxu0 %v3215_v33  ;;  %v3274_v33 = vld [vmem:[#allocation3 + $0x354] ss:$8 sps:$4 sm:$0xff]  }
  0xaf   :  { %958 = vmatpush1.bf16.msra.mxu0 %v3213_v36  ;;  %v3370_v36 = vld [vmem:[#allocation5 + $0xd0] ss:$8 sps:$4 sm:$0xff]  }
  0xb0   :  { %959 = vmatprep.subr.bf16.mxu0 %v3218_v37  ;;  %v3372_v37 = vld [vmem:[#allocation5 + $0xd4] ss:$8 sps:$4 sm:$0xff]  }
  0xb1   :  { %1425 = vmatprep.subr.bf16.mxu1 %v3372_v37  ;;  %v3391_v37 = vld [vmem:[#allocation5 + $0x140] ss:$8 sps:$4 sm:$0xff]  }
  0xb2   :  { %1426 = vmatpush1.bf16.msra.mxu1 %v3370_v36  ;;  %v3393_v36 = vld [vmem:[#allocation5 + $0x144] ss:$8 sps:$4 sm:$0xff]  }
  0xb3   :  { %960 = vmatpush1.bf16.msra.mxu0 %v3216_v38  ;;  %v3275_v38 = vld [vmem:[#allocation3 + $0x360] ss:$8 sps:$4 sm:$0xff]   ;;  %1427 = vmatprep.subr.bf16.mxu1 %v3375_v62 }
  0xb4   :  { %961 = vmatprep.subr.bf16.mxu0 %v3221_v40  ;;  %v3278_v40 = vld [vmem:[#allocation3 + $0x370] ss:$8 sps:$4 sm:$0xff]  }
  0xb6   :  { %1428 = vmatpush1.bf16.msra.mxu1 %v3373_v63 }
  0xb7   :  { %962 = vmatpush1.bf16.msra.mxu0 %v3219_v44  ;;  %v3290_v44 = vld [vmem:[#allocation3 + $0x390] ss:$8 sps:$4 sm:$0xff]  }
  0xb8   :  { %963 = vmatprep.subr.bf16.mxu0 %v3224_v45  ;;  %v3298_v45 = vld [vmem:[#allocation3 + $0x3a4] ss:$8 sps:$4 sm:$0xff]  }
  0xbb   :  { %964 = vmatpush1.bf16.msra.mxu0 %v3222_v48  ;;  %v3302_v48 = vld [vmem:[#allocation3 + $0x3b0] ss:$8 sps:$4 sm:$0xff]  }
  0xbc   :  { %965 = vmatprep.subr.bf16.mxu0 %v3227_v49  ;;  %v3310_v49 = vld [vmem:[#allocation3 + $0x3c4] ss:$8 sps:$4 sm:$0xff]  }
  0xbf   :  { %966 = vmatpush1.bf16.msra.mxu0 %v3225_v52  ;;  %v3314_v52 = vld [vmem:[#allocation3 + $0x3d0] ss:$8 sps:$4 sm:$0xff]  }
  0xc0   :  { %967 = vmatprep.subr.bf16.mxu0 %v3230_v53  ;;  %v3322_v53 = vld [vmem:[#allocation3 + $0x3e4] ss:$8 sps:$4 sm:$0xff]  }
  0xc3   :  { %968 = vmatpush1.bf16.msra.mxu0 %v3228_v56  ;;  %v3326_v56 = vld [vmem:[#allocation3 + $0x3f0] ss:$8 sps:$4 sm:$0xff]  }
  0xc4   :  { %969 = vmatprep.subr.bf16.mxu0 %v3233_v57  ;;  %v2743_v57 = vcombine.low %v3818_v21, %v3818_v21 }
  0xc7   :  { %970 = vmatpush1.bf16.msra.mxu0 %v3231_v60 }
  0xc8   :  { %971 = vmatprep.subr.bf16.mxu0 %v3236_v61 }
  0xcb   :  { %972 = vmatpush1.bf16.msra.mxu0 %v3234_v0  ;;  %v3378_v0 = vld [vmem:[#allocation5 + $0xf4] ss:$8 sps:$4 sm:$0xff]  }
  0xcc   :  { %973 = vmatprep.subr.bf16.mxu0 %v3239_v1  ;;  %v3376_v1 = vld [vmem:[#allocation5 + $0xf0] ss:$8 sps:$4 sm:$0xff]   ;;  %1429 = vmatprep.subr.bf16.mxu1 %v3378_v0 }
  0xcd   :  { %1430 = vmatpush1.bf16.msra.mxu1 %v3376_v1 }
  0xce   :  { %1650 = vmatprep.subr.bf16.mxu1 %v3381_v2 }
  0xcf   :  { %974 = vmatpush1.bf16.msra.mxu0 %v3237_v4  ;;  %v194_v4 = vshrl.u32 %v193_v3, 7 }
  0xd0   :  { %975 = vmatprep.subr.bf16.mxu0 %v3242_v5 }
  0xd1   :  { %v3826_v5 = vsub.s32 0, %v194_v4  ;;  %v3831_v7 = vsub.s32 1, %v194_v4 }
  0xd3   :  { %976 = vmatpush1.bf16.msra.mxu0 %v3240_v8  ;;  %v1060_v8 = vrot.slane %v2873_v6, %v3826_v5  ;;  %v200_v14 = vrot.slane %v191_v10, %v3831_v7 }
  0xd4   :  { %977 = vmatprep.subr.bf16.mxu0 %v3245_v9  ;;  %v1064_v9 = vrot.slane %v2873_v6, %v3831_v7 }
  0xd7   :  { %978 = vmatpush1.bf16.msra.mxu0 %v3243_v12  ;;  %v196_v12 = vrot.slane %v191_v10, %v3826_v5 }
  0xd8   :  { %979 = vmatprep.subr.bf16.mxu0 %v3248_v13 }
  0xdb   :  { %980 = vmatpush1.bf16.msra.mxu0 %v3246_v15 }
  0xdc   :  { %981 = vmatprep.subr.bf16.mxu0 %v3251_v16 }
  0xdf   :  { %982 = vmatpush1.bf16.msra.mxu0 %v3249_v17 }
  0xe0   :  { %983 = vmatprep.subr.bf16.mxu0 %v3254_v18 }
  0xe3   :  { %984 = vmatpush1.bf16.msra.mxu0 %v3252_v19 }
  0xe4   :  { %994 = vmatprep.subr.bf16.mxu0 %v3259_v20 }
  0xe6   :  { %986 = vmatmul.mubr.bf16.vlgmr.msra.gmra.mrb[0].mxu0 %v2741_v23 }
  0xe7   :  { %995 = vmatpush1.bf16.msra.mxu0 %v3257_v24  ;;  %1026 = vmatprep.mubr.bf16.mxu0 %v2744_v25 }
  0xe8   :  { %996 = vmatprep.subr.bf16.mxu0 %v3262_v26 }
  0xeb   :  { %997 = vmatpush1.bf16.msra.mxu0 %v3260_v27 }
  0xec   :  { %998 = vmatprep.subr.bf16.mxu0 %v3265_v28 }
  0xef   :  { %999 = vmatpush1.bf16.msra.mxu0 %v3263_v29  ;;  %v3379_v29 = vld [vmem:[#allocation5 + $0x100] ss:$8 sps:$4 sm:$0xff]  }
  0xf0   :  { %1000 = vmatprep.subr.bf16.mxu0 %v3268_v30 }
  0xf3   :  { %1001 = vmatpush1.bf16.msra.mxu0 %v3266_v31  ;;  %v3384_v31 = vld [vmem:[#allocation5 + $0x114] ss:$8 sps:$4 sm:$0xff]  }
  0xf4   :  { %1002 = vmatprep.subr.bf16.mxu0 %v3271_v22  ;;  %v3382_v22 = vld [vmem:[#allocation5 + $0x110] ss:$8 sps:$4 sm:$0xff]  }
  0xf7   :  { %1003 = vmatpush1.bf16.msra.mxu0 %v3269_v32  ;;  %v3387_v32 = vld [vmem:[#allocation5 + $0x124] ss:$8 sps:$4 sm:$0xff]  }
  0xf8   :  { %1004 = vmatprep.subr.bf16.mxu0 %v3274_v33  ;;  %v3385_v33 = vld [vmem:[#allocation5 + $0x120] ss:$8 sps:$4 sm:$0xff]  }
  0xfb   :  { %1005 = vmatpush1.bf16.msra.mxu0 %v3272_v34  ;;  %v3390_v34 = vld [vmem:[#allocation5 + $0x134] ss:$8 sps:$4 sm:$0xff]  }
  0xfc   :  { %1006 = vmatprep.subr.bf16.mxu0 %v3277_v35  ;;  %v3388_v35 = vld [vmem:[#allocation5 + $0x130] ss:$8 sps:$4 sm:$0xff]  }
  0xff   :  { %1007 = vmatpush1.bf16.msra.mxu0 %v3275_v38  ;;  %v3396_v38 = vld [vmem:[#allocation5 + $0x154] ss:$8 sps:$4 sm:$0xff]  }
 0x100   :  { %1008 = vmatprep.subr.bf16.mxu0 %v3280_v39  ;;  %v3394_v39 = vld [vmem:[#allocation5 + $0x150] ss:$8 sps:$4 sm:$0xff]  }
 0x103   :  { %1009 = vmatpush1.bf16.msra.mxu0 %v3278_v40  ;;  %v3399_v40 = vld [vmem:[#allocation5 + $0x164] ss:$8 sps:$4 sm:$0xff]  }
 0x104   :  { %1010 = vmatprep.subr.bf16.mxu0 %v3286_v41  ;;  %v3397_v41 = vld [vmem:[#allocation5 + $0x160] ss:$8 sps:$4 sm:$0xff]  }
 0x107   :  { %1011 = vmatpush1.bf16.msra.mxu0 %v3284_v42  ;;  %v3402_v42 = vld [vmem:[#allocation5 + $0x174] ss:$8 sps:$4 sm:$0xff]  }
 0x108   :  { %1012 = vmatprep.subr.bf16.mxu0 %v3292_v43  ;;  %v3400_v43 = vld [vmem:[#allocation5 + $0x170] ss:$8 sps:$4 sm:$0xff]  }
 0x10b   :  { %1013 = vmatpush1.bf16.msra.mxu0 %v3290_v44  ;;  %v3405_v44 = vld [vmem:[#allocation5 + $0x184] ss:$8 sps:$4 sm:$0xff]  }
 0x10c   :  { %1014 = vmatprep.subr.bf16.mxu0 %v3298_v45  ;;  %v3403_v45 = vld [vmem:[#allocation5 + $0x180] ss:$8 sps:$4 sm:$0xff]  }
 0x10f   :  { %1015 = vmatpush1.bf16.msra.mxu0 %v3296_v46  ;;  %v3408_v46 = vld [vmem:[#allocation5 + $0x194] ss:$8 sps:$4 sm:$0xff]  }
 0x110   :  { %1016 = vmatprep.subr.bf16.mxu0 %v3304_v47  ;;  %v3406_v47 = vld [vmem:[#allocation5 + $0x190] ss:$8 sps:$4 sm:$0xff]  }
 0x113   :  { %1017 = vmatpush1.bf16.msra.mxu0 %v3302_v48  ;;  %v3411_v48 = vld [vmem:[#allocation5 + $0x1a4] ss:$8 sps:$4 sm:$0xff]  }
 0x114   :  { %1018 = vmatprep.subr.bf16.mxu0 %v3310_v49  ;;  %v3409_v49 = vld [vmem:[#allocation5 + $0x1a0] ss:$8 sps:$4 sm:$0xff]  }
 0x117   :  { %1019 = vmatpush1.bf16.msra.mxu0 %v3308_v50  ;;  %v3414_v50 = vld [vmem:[#allocation5 + $0x1b4] ss:$8 sps:$4 sm:$0xff]  }
 0x118   :  { %1020 = vmatprep.subr.bf16.mxu0 %v3316_v51  ;;  %v3412_v51 = vld [vmem:[#allocation5 + $0x1b0] ss:$8 sps:$4 sm:$0xff]  }
 0x11b   :  { %1021 = vmatpush1.bf16.msra.mxu0 %v3314_v52  ;;  %v3417_v52 = vld [vmem:[#allocation5 + $0x1c4] ss:$8 sps:$4 sm:$0xff]  }
 0x11c   :  { %1022 = vmatprep.subr.bf16.mxu0 %v3322_v53  ;;  %v3415_v53 = vld [vmem:[#allocation5 + $0x1c0] ss:$8 sps:$4 sm:$0xff]  }
 0x11f   :  { %1023 = vmatpush1.bf16.msra.mxu0 %v3320_v54  ;;  %v3420_v54 = vld [vmem:[#allocation5 + $0x1d4] ss:$8 sps:$4 sm:$0xff]  }
 0x120   :  { %1024 = vmatprep.subr.bf16.mxu0 %v3328_v55  ;;  %v3418_v55 = vld [vmem:[#allocation5 + $0x1d0] ss:$8 sps:$4 sm:$0xff]  }
 0x123   :  { %1025 = vmatpush1.bf16.msra.mxu0 %v3326_v56  ;;  %v3423_v56 = vld [vmem:[#allocation5 + $0x1e4] ss:$8 sps:$4 sm:$0xff]  }
 0x126   :  { %1027 = vmatmul.mubr.bf16.vlgmr.msra.gmra.mrb[0].mxu0 %v2743_v57  ;;  %v3421_v57 = vld [vmem:[#allocation5 + $0x1e0] ss:$8 sps:$4 sm:$0xff]  }
 0x12b   :  { %v1181_v58 = vpop.f32.mrb[0].mxu1 }
 0x12c   :  { %v1183_v59 = vpop.f32.mrb[1].mxu1  ;;  %v1182_v11 = vadd.f32 %v1181_v58, %v1060_v8  ;;  %v3426_v58 = vld [vmem:[#allocation5 + $0x1f4] ss:$8 sps:$4 sm:$0xff]  }
 0x12d   :  { %v1185_v60 = vpop.f32.mrb[2].mxu1  ;;  %v1184_v13 = vadd.f32 %v1183_v59, %v1064_v9  ;;  %v3424_v59 = vld [vmem:[#allocation5 + $0x1f0] ss:$8 sps:$4 sm:$0xff]  }
 0x12e   :  { %v1186_v61 = vpop.f32.mrb[3].mxu1  ;;  %v1188_v16 = vmax.f32 %v1182_v11, 0.0  ;;  %v3429_v60 = vld [vmem:[#allocation5 + $0x204] ss:$8 sps:$4 sm:$0xff]   ;;  %v3427_v11 = vld [vmem:[#allocation5 + $0x200] ss:$8 sps:$4 sm:$0xff]  }
 0x12f   :  { %v1189_v19 = vmax.f32 %v1184_v13, 0.0  ;;  %v2890_v61 = vld [vmem:[%s3906_s5 + $0x2] ss:$8 sm:$0x3]  ;;  %v3432_v13 = vld [vmem:[#allocation5 + $0x214] ss:$8 sps:$4 sm:$0xff]  }
 0x130   :  { %v1232_v62 = vrot.slane %v2890_v61, %v3826_v5  ;;  %v1236_v63 = vrot.slane %v2890_v61, %v3831_v7 }
 0x1f9   :  { %v1028_v15 = vpop.f32.mrb[0].mxu0 }
 0x1fa   :  { %v3088_v17 = vadd.f32 %v1028_v15, %v196_v12  ;;  %v1030_v18 = vpop.f32.mrb[1].mxu0  ;;  %v3435_v15 = vld [vmem:[#allocation5 + $0x224] ss:$8 sps:$4 sm:$0xff]  }
 0x1fb   :  { %v3089_v20 = vadd.f32 %v1030_v18, %v200_v14  ;;  %v1032_v21 = vpop.f32.mrb[2].mxu0  ;;  %v3430_v14 = vld [vmem:[#allocation5 + $0x210] ss:$8 sps:$4 sm:$0xff]  }
 0x1fc   :  { %v1035_v23 = vmax.f32 %v3088_v17, 0.0  ;;  %v1033_v24 = vpop.f32.mrb[3].mxu0  ;;  %v3438_v17 = vld [vmem:[#allocation5 + $0x234] ss:$8 sps:$4 sm:$0xff]   ;;  %v3436_v18 = vld [vmem:[#allocation5 + $0x230] ss:$8 sps:$4 sm:$0xff]  }
 0x1fd   :  { %v1036_v25 = vmax.f32 %v3089_v20, 0.0  ;;  %v3439_v20 = vld [vmem:[#allocation5 + $0x240] ss:$8 sps:$4 sm:$0xff]   ;;  %v3444_v21 = vld [vmem:[#allocation5 + $0x254] ss:$8 sps:$4 sm:$0xff]  }
 0x1fe   :  { %v3840_v26 = vadd.f32 %v1188_v16, %v1035_v23  ;;  %v3433_v16 = vld [vmem:[#allocation5 + $0x220] ss:$8 sps:$4 sm:$0xff]   ;;  %v3442_v23 = vld [vmem:[#allocation5 + $0x250] ss:$8 sps:$4 sm:$0xff]   ;;  %v3447_v24 = vld [vmem:[#allocation5 + $0x264] ss:$8 sps:$4 sm:$0xff]  }
 0x1ff   :  { %v3842_v27 = vadd.f32 %v1189_v19, %v1036_v25  ;;  %v3441_v19 = vld [vmem:[#allocation5 + $0x244] ss:$8 sps:$4 sm:$0xff]   ;;  %v3445_v25 = vld [vmem:[#allocation5 + $0x260] ss:$8 sps:$4 sm:$0xff]  }
 0x200   :  { %v1192_v30 = vpack.c.bf16 %v3840_v26, %v3840_v26 }
 0x201   :  { %v1193_v28 = vpack.c.bf16 %v3842_v27, %v3842_v27 }
 0x203   :  { %1431 = vmatprep.mubr.bf16.mxu1 %v1193_v28  ;;  %v3450_v28 = vld [vmem:[#allocation5 + $0x274] ss:$8 sps:$4 sm:$0xff]  }
 0x204   :  { %1432 = vmatmul.mubr.bf16.vlgmr.msra.gmra.mrb[4].mxu1 %v1192_v30  ;;  %v3453_v30 = vld [vmem:[#allocation5 + $0x284] ss:$8 sps:$4 sm:$0xff]  }
 0x205   :  { %1651 = vmatpush1.bf16.msra.mxu1 %v3379_v29  ;;  %v3448_v29 = vld [vmem:[#allocation5 + $0x270] ss:$8 sps:$4 sm:$0xff]  }
 0x206   :  { %1652 = vmatprep.subr.bf16.mxu1 %v3384_v31  ;;  %v3451_v31 = vld [vmem:[#allocation5 + $0x280] ss:$8 sps:$4 sm:$0xff]  }
 0x209   :  { %1653 = vmatpush1.bf16.msra.mxu1 %v3382_v22  ;;  %v3456_v22 = vld [vmem:[#allocation5 + $0x294] ss:$8 sps:$4 sm:$0xff]  }
 0x20a   :  { %1654 = vmatprep.subr.bf16.mxu1 %v3387_v32  ;;  %v3454_v32 = vld [vmem:[#allocation5 + $0x290] ss:$8 sps:$4 sm:$0xff]  }
 0x20d   :  { %1655 = vmatpush1.bf16.msra.mxu1 %v3385_v33  ;;  %v3459_v33 = vld [vmem:[#allocation5 + $0x2a4] ss:$8 sps:$4 sm:$0xff]  }
 0x20e   :  { %1656 = vmatprep.subr.bf16.mxu1 %v3390_v34  ;;  %v3457_v34 = vld [vmem:[#allocation5 + $0x2a0] ss:$8 sps:$4 sm:$0xff]  }
 0x211   :  { %1657 = vmatpush1.bf16.msra.mxu1 %v3388_v35  ;;  %v3462_v35 = vld [vmem:[#allocation5 + $0x2b4] ss:$8 sps:$4 sm:$0xff]  }
 0x212   :  { %1658 = vmatprep.subr.bf16.mxu1 %v3393_v36  ;;  %v3460_v36 = vld [vmem:[#allocation5 + $0x2b0] ss:$8 sps:$4 sm:$0xff]  }
 0x215   :  { %1659 = vmatpush1.bf16.msra.mxu1 %v3391_v37  ;;  %v3465_v37 = vld [vmem:[#allocation5 + $0x2c4] ss:$8 sps:$4 sm:$0xff]  }
 0x216   :  { %1660 = vmatprep.subr.bf16.mxu1 %v3396_v38  ;;  %v3463_v38 = vld [vmem:[#allocation5 + $0x2c0] ss:$8 sps:$4 sm:$0xff]  }
 0x219   :  { %1661 = vmatpush1.bf16.msra.mxu1 %v3394_v39  ;;  %v3468_v39 = vld [vmem:[#allocation5 + $0x2d4] ss:$8 sps:$4 sm:$0xff]  }
 0x21a   :  { %1662 = vmatprep.subr.bf16.mxu1 %v3399_v40  ;;  %v3466_v40 = vld [vmem:[#allocation5 + $0x2d0] ss:$8 sps:$4 sm:$0xff]  }
 0x21d   :  { %1663 = vmatpush1.bf16.msra.mxu1 %v3397_v41  ;;  %v3471_v41 = vld [vmem:[#allocation5 + $0x2e4] ss:$8 sps:$4 sm:$0xff]  }
 0x21e   :  { %1664 = vmatprep.subr.bf16.mxu1 %v3402_v42  ;;  %v3469_v42 = vld [vmem:[#allocation5 + $0x2e0] ss:$8 sps:$4 sm:$0xff]  }
 0x221   :  { %1665 = vmatpush1.bf16.msra.mxu1 %v3400_v43  ;;  %v3474_v43 = vld [vmem:[#allocation5 + $0x2f4] ss:$8 sps:$4 sm:$0xff]  }
 0x222   :  { %1666 = vmatprep.subr.bf16.mxu1 %v3405_v44  ;;  %v3472_v44 = vld [vmem:[#allocation5 + $0x2f0] ss:$8 sps:$4 sm:$0xff]  }
 0x225   :  { %1667 = vmatpush1.bf16.msra.mxu1 %v3403_v45  ;;  %v3477_v45 = vld [vmem:[#allocation5 + $0x304] ss:$8 sps:$4 sm:$0xff]  }
 0x226   :  { %1668 = vmatprep.subr.bf16.mxu1 %v3408_v46  ;;  %v2923_v46 = vld [vmem:[%s3906_s5 + $0x3] ss:$8 sm:$0x3] }
 0x229   :  { %1669 = vmatpush1.bf16.msra.mxu1 %v3406_v47  ;;  %v1483_v47 = vrot.slane %v2923_v46, %v3826_v5 }
 0x22a   :  { %1670 = vmatprep.subr.bf16.mxu1 %v3411_v48  ;;  %v1487_v48 = vrot.slane %v2923_v46, %v3831_v7  ;;  %v3549_v46 = vld [vmem:[#allocation5 + $0x484] ss:$8 sps:$4 sm:$0xff]  }
 0x22d   :  { %1671 = vmatpush1.bf16.msra.mxu1 %v3409_v49 }
 0x22e   :  { %1672 = vmatprep.subr.bf16.mxu1 %v3414_v50 }
 0x231   :  { %1673 = vmatpush1.bf16.msra.mxu1 %v3412_v51 }
 0x232   :  { %1674 = vmatprep.subr.bf16.mxu1 %v3417_v52 }
 0x235   :  { %1675 = vmatpush1.bf16.msra.mxu1 %v3415_v53 }
 0x236   :  { %1676 = vmatprep.subr.bf16.mxu1 %v3420_v54 }
 0x239   :  { %1677 = vmatpush1.bf16.msra.mxu1 %v3418_v55 }
 0x23a   :  { %1678 = vmatprep.subr.bf16.mxu1 %v3423_v56 }
 0x23d   :  { %1679 = vmatpush1.bf16.msra.mxu1 %v3421_v57 }
 0x23e   :  { %1680 = vmatprep.subr.bf16.mxu1 %v3426_v58 }
 0x241   :  { %1681 = vmatpush1.bf16.msra.mxu1 %v3424_v59 }
 0x242   :  { %1903 = vmatprep.subr.bf16.mxu1 %v3429_v60  ;;  %v3475_v60 = vld [vmem:[#allocation5 + $0x300] ss:$8 sps:$4 sm:$0xff]  }
 0x2d7   :  { %v1433_v0 = vpop.f32.mrb[4].mxu1 }
 0x2d8   :  { %v1434_v1 = vadd.f32 %v1433_v0, %v1232_v62  ;;  %v1435_v2 = vpop.f32.mrb[5].mxu1  ;;  %v3480_v62 = vld [vmem:[#allocation5 + $0x314] ss:$8 sps:$4 sm:$0xff]   ;;  %v3483_v0 = vld [vmem:[#allocation5 + $0x324] ss:$8 sps:$4 sm:$0xff]  }
 0x2d9   :  { %v1436_v3 = vadd.f32 %v1435_v2, %v1236_v63  ;;  %v1437_v4 = vpop.f32.mrb[6].mxu1  ;;  %v3478_v63 = vld [vmem:[#allocation5 + $0x310] ss:$8 sps:$4 sm:$0xff]   ;;  %v3489_v2 = vld [vmem:[#allocation5 + $0x344] ss:$8 sps:$4 sm:$0xff]  }
 0x2da   :  { %v1440_v6 = vmax.f32 %v1434_v1, 0.0  ;;  %v1438_v8 = vpop.f32.mrb[7].mxu1  ;;  %v3486_v1 = vld [vmem:[#allocation5 + $0x334] ss:$8 sps:$4 sm:$0xff]  }
 0x2db   :  { %v1441_v9 = vmax.f32 %v1436_v3, 0.0  ;;  %v3487_v3 = vld [vmem:[#allocation5 + $0x340] ss:$8 sps:$4 sm:$0xff]   ;;  %v3492_v4 = vld [vmem:[#allocation5 + $0x354] ss:$8 sps:$4 sm:$0xff]  }
 0x2dc   :  { %v1442_v12 = vpack.c.bf16 %v1440_v6, %v1440_v6  ;;  %v3490_v6 = vld [vmem:[#allocation5 + $0x350] ss:$8 sps:$4 sm:$0xff]   ;;  %v3495_v8 = vld [vmem:[#allocation5 + $0x364] ss:$8 sps:$4 sm:$0xff]  }
 0x2dd   :  { %v1443_v10 = vpack.c.bf16 %v1441_v9, %v1441_v9  ;;  %v3493_v9 = vld [vmem:[#allocation5 + $0x360] ss:$8 sps:$4 sm:$0xff]  }
 0x2df   :  { %1682 = vmatprep.mubr.bf16.mxu1 %v1443_v10  ;;  %v3498_v10 = vld [vmem:[#allocation5 + $0x374] ss:$8 sps:$4 sm:$0xff]  }
 0x2e0   :  { %1683 = vmatmul.mubr.bf16.vlgmr.msra.gmra.mrb[8].mxu1 %v1442_v12  ;;  %v3501_v12 = vld [vmem:[#allocation5 + $0x384] ss:$8 sps:$4 sm:$0xff]  }
 0x2e1   :  { %1904 = vmatpush1.bf16.msra.mxu1 %v3427_v11  ;;  %v3496_v11 = vld [vmem:[#allocation5 + $0x370] ss:$8 sps:$4 sm:$0xff]  }
 0x2e2   :  { %1905 = vmatprep.subr.bf16.mxu1 %v3432_v13  ;;  %v3499_v13 = vld [vmem:[#allocation5 + $0x380] ss:$8 sps:$4 sm:$0xff]  }
 0x2e5   :  { %1906 = vmatpush1.bf16.msra.mxu1 %v3430_v14  ;;  %v3504_v14 = vld [vmem:[#allocation5 + $0x394] ss:$8 sps:$4 sm:$0xff]  }
 0x2e6   :  { %1907 = vmatprep.subr.bf16.mxu1 %v3435_v15  ;;  %v3502_v15 = vld [vmem:[#allocation5 + $0x390] ss:$8 sps:$4 sm:$0xff]  }
 0x2e9   :  { %1908 = vmatpush1.bf16.msra.mxu1 %v3433_v16  ;;  %v3507_v16 = vld [vmem:[#allocation5 + $0x3a4] ss:$8 sps:$4 sm:$0xff]  }
 0x2ea   :  { %1909 = vmatprep.subr.bf16.mxu1 %v3438_v17  ;;  %v3505_v17 = vld [vmem:[#allocation5 + $0x3a0] ss:$8 sps:$4 sm:$0xff]  }
 0x2ed   :  { %1910 = vmatpush1.bf16.msra.mxu1 %v3436_v18  ;;  %v3510_v18 = vld [vmem:[#allocation5 + $0x3b4] ss:$8 sps:$4 sm:$0xff]  }
 0x2ee   :  { %1911 = vmatprep.subr.bf16.mxu1 %v3441_v19  ;;  %v3508_v19 = vld [vmem:[#allocation5 + $0x3b0] ss:$8 sps:$4 sm:$0xff]  }
 0x2f1   :  { %1912 = vmatpush1.bf16.msra.mxu1 %v3439_v20  ;;  %v3513_v20 = vld [vmem:[#allocation5 + $0x3c4] ss:$8 sps:$4 sm:$0xff]  }
 0x2f2   :  { %1913 = vmatprep.subr.bf16.mxu1 %v3444_v21  ;;  %v3511_v21 = vld [vmem:[#allocation5 + $0x3c0] ss:$8 sps:$4 sm:$0xff]  }
 0x2f5   :  { %1914 = vmatpush1.bf16.msra.mxu1 %v3442_v23  ;;  %v3516_v23 = vld [vmem:[#allocation5 + $0x3d4] ss:$8 sps:$4 sm:$0xff]  }
 0x2f6   :  { %1915 = vmatprep.subr.bf16.mxu1 %v3447_v24  ;;  %v3514_v24 = vld [vmem:[#allocation5 + $0x3d0] ss:$8 sps:$4 sm:$0xff]  }
 0x2f9   :  { %1916 = vmatpush1.bf16.msra.mxu1 %v3445_v25  ;;  %v3519_v25 = vld [vmem:[#allocation5 + $0x3e4] ss:$8 sps:$4 sm:$0xff]  }
 0x2fa   :  { %1917 = vmatprep.subr.bf16.mxu1 %v3450_v28  ;;  %v3517_v28 = vld [vmem:[#allocation5 + $0x3e0] ss:$8 sps:$4 sm:$0xff]  }
 0x2fd   :  { %1918 = vmatpush1.bf16.msra.mxu1 %v3448_v29  ;;  %v3522_v29 = vld [vmem:[#allocation5 + $0x3f4] ss:$8 sps:$4 sm:$0xff]  }
 0x2fe   :  { %1919 = vmatprep.subr.bf16.mxu1 %v3453_v30  ;;  %v3520_v30 = vld [vmem:[#allocation5 + $0x3f0] ss:$8 sps:$4 sm:$0xff]  }
 0x301   :  { %1920 = vmatpush1.bf16.msra.mxu1 %v3451_v31  ;;  %v3523_v31 = vld [vmem:[#allocation5 + $0x400] ss:$8 sps:$4 sm:$0xff]  }
 0x302   :  { %1921 = vmatprep.subr.bf16.mxu1 %v3456_v22  ;;  %v3525_v22 = vld [vmem:[#allocation5 + $0x404] ss:$8 sps:$4 sm:$0xff]  }
 0x303   :  { %2407 = vmatprep.subr.bf16.mxu0 %v3525_v22  ;;  %v3597_v22 = vld [vmem:[#allocation5 + $0x584] ss:$8 sps:$4 sm:$0xff]  }
 0x304   :  { %2408 = vmatpush1.bf16.msra.mxu0 %v3523_v31  ;;  %v3592_v31 = vld [vmem:[#allocation5 + $0x570] ss:$8 sps:$4 sm:$0xff]  }
 0x305   :  { %1922 = vmatpush1.bf16.msra.mxu1 %v3454_v32  ;;  %v3528_v32 = vld [vmem:[#allocation5 + $0x414] ss:$8 sps:$4 sm:$0xff]  }
 0x306   :  { %1923 = vmatprep.subr.bf16.mxu1 %v3459_v33  ;;  %v3526_v33 = vld [vmem:[#allocation5 + $0x410] ss:$8 sps:$4 sm:$0xff]   ;;  %2409 = vmatprep.subr.bf16.mxu0 %v3528_v32  ;;  %v3595_v32 = vld [vmem:[#allocation5 + $0x580] ss:$8 sps:$4 sm:$0xff]  }
 0x308   :  { %2410 = vmatpush1.bf16.msra.mxu0 %v3526_v33  ;;  %v3600_v33 = vld [vmem:[#allocation5 + $0x594] ss:$8 sps:$4 sm:$0xff]  }
 0x309   :  { %1924 = vmatpush1.bf16.msra.mxu1 %v3457_v34  ;;  %v3531_v34 = vld [vmem:[#allocation5 + $0x424] ss:$8 sps:$4 sm:$0xff]  }
 0x30a   :  { %1925 = vmatprep.subr.bf16.mxu1 %v3462_v35  ;;  %v3529_v35 = vld [vmem:[#allocation5 + $0x420] ss:$8 sps:$4 sm:$0xff]   ;;  %2411 = vmatprep.subr.bf16.mxu0 %v3531_v34  ;;  %v3598_v34 = vld [vmem:[#allocation5 + $0x590] ss:$8 sps:$4 sm:$0xff]  }
 0x30c   :  { %2412 = vmatpush1.bf16.msra.mxu0 %v3529_v35  ;;  %v3603_v35 = vld [vmem:[#allocation5 + $0x5a4] ss:$8 sps:$4 sm:$0xff]  }
 0x30d   :  { %1926 = vmatpush1.bf16.msra.mxu1 %v3460_v36  ;;  %v3534_v36 = vld [vmem:[#allocation5 + $0x434] ss:$8 sps:$4 sm:$0xff]  }
 0x30e   :  { %1927 = vmatprep.subr.bf16.mxu1 %v3465_v37  ;;  %v3532_v37 = vld [vmem:[#allocation5 + $0x430] ss:$8 sps:$4 sm:$0xff]   ;;  %2413 = vmatprep.subr.bf16.mxu0 %v3534_v36  ;;  %v3601_v36 = vld [vmem:[#allocation5 + $0x5a0] ss:$8 sps:$4 sm:$0xff]  }
 0x310   :  { %2414 = vmatpush1.bf16.msra.mxu0 %v3532_v37  ;;  %v3606_v37 = vld [vmem:[#allocation5 + $0x5b4] ss:$8 sps:$4 sm:$0xff]  }
 0x311   :  { %1928 = vmatpush1.bf16.msra.mxu1 %v3463_v38  ;;  %v3537_v38 = vld [vmem:[#allocation5 + $0x444] ss:$8 sps:$4 sm:$0xff]  }
 0x312   :  { %1929 = vmatprep.subr.bf16.mxu1 %v3468_v39  ;;  %v3535_v39 = vld [vmem:[#allocation5 + $0x440] ss:$8 sps:$4 sm:$0xff]   ;;  %2415 = vmatprep.subr.bf16.mxu0 %v3537_v38  ;;  %v3604_v38 = vld [vmem:[#allocation5 + $0x5b0] ss:$8 sps:$4 sm:$0xff]  }
 0x314   :  { %2416 = vmatpush1.bf16.msra.mxu0 %v3535_v39  ;;  %v3609_v39 = vld [vmem:[#allocation5 + $0x5c4] ss:$8 sps:$4 sm:$0xff]  }
 0x315   :  { %1930 = vmatpush1.bf16.msra.mxu1 %v3466_v40  ;;  %v3540_v40 = vld [vmem:[#allocation5 + $0x454] ss:$8 sps:$4 sm:$0xff]  }
 0x316   :  { %1931 = vmatprep.subr.bf16.mxu1 %v3471_v41  ;;  %v3538_v41 = vld [vmem:[#allocation5 + $0x450] ss:$8 sps:$4 sm:$0xff]   ;;  %2417 = vmatprep.subr.bf16.mxu0 %v3540_v40  ;;  %v3607_v40 = vld [vmem:[#allocation5 + $0x5c0] ss:$8 sps:$4 sm:$0xff]  }
 0x318   :  { %2418 = vmatpush1.bf16.msra.mxu0 %v3538_v41  ;;  %v3612_v41 = vld [vmem:[#allocation5 + $0x5d4] ss:$8 sps:$4 sm:$0xff]  }
 0x319   :  { %1932 = vmatpush1.bf16.msra.mxu1 %v3469_v42  ;;  %v3543_v42 = vld [vmem:[#allocation5 + $0x464] ss:$8 sps:$4 sm:$0xff]  }
 0x31a   :  { %1933 = vmatprep.subr.bf16.mxu1 %v3474_v43  ;;  %v3541_v43 = vld [vmem:[#allocation5 + $0x460] ss:$8 sps:$4 sm:$0xff]   ;;  %2419 = vmatprep.subr.bf16.mxu0 %v3543_v42  ;;  %v3610_v42 = vld [vmem:[#allocation5 + $0x5d0] ss:$8 sps:$4 sm:$0xff]  }
 0x31c   :  { %2420 = vmatpush1.bf16.msra.mxu0 %v3541_v43  ;;  %v2989_v43 = vld [vmem:[%s3906_s5 + $0x5] ss:$8 sm:$0x3] }
 0x31d   :  { %1934 = vmatpush1.bf16.msra.mxu1 %v3472_v44  ;;  %v3546_v44 = vld [vmem:[#allocation5 + $0x474] ss:$8 sps:$4 sm:$0xff]  }
 0x31e   :  { %2154 = vmatprep.subr.bf16.mxu1 %v3477_v45  ;;  %v3544_v45 = vld [vmem:[#allocation5 + $0x470] ss:$8 sps:$4 sm:$0xff]   ;;  %2421 = vmatprep.subr.bf16.mxu0 %v3546_v44  ;;  %v1987_v44 = vrot.slane %v2989_v43, %v3826_v5 }
 0x320   :  { %2422 = vmatpush1.bf16.msra.mxu0 %v3544_v45  ;;  %v1991_v45 = vrot.slane %v2989_v43, %v3831_v7 }
 0x321   :  { %2423 = vmatprep.subr.bf16.mxu0 %v3549_v46 }
 0x3b3   :  { %v1684_v49 = vpop.f32.mrb[8].mxu1 }
 0x3b4   :  { %v1685_v50 = vadd.f32 %v1684_v49, %v1483_v47  ;;  %v1686_v51 = vpop.f32.mrb[9].mxu1  ;;  %v3547_v47 = vld [vmem:[#allocation5 + $0x480] ss:$8 sps:$4 sm:$0xff]   ;;  %v3550_v49 = vld [vmem:[#allocation5 + $0x490] ss:$8 sps:$4 sm:$0xff]  }
 0x3b5   :  { %v1687_v52 = vadd.f32 %v1686_v51, %v1487_v48  ;;  %v1688_v53 = vpop.f32.mrb[10].mxu1  ;;  %v3552_v48 = vld [vmem:[#allocation5 + $0x494] ss:$8 sps:$4 sm:$0xff]   ;;  %2424 = vmatpush1.bf16.msra.mxu0 %v3547_v47  ;;  %v3553_v51 = vld [vmem:[#allocation5 + $0x4a0] ss:$8 sps:$4 sm:$0xff]  }
 0x3b6   :  { %v1691_v54 = vmax.f32 %v1685_v50, 0.0  ;;  %v1689_v55 = vpop.f32.mrb[11].mxu1  ;;  %2425 = vmatprep.subr.bf16.mxu0 %v3552_v48  ;;  %v3555_v50 = vld [vmem:[#allocation5 + $0x4a4] ss:$8 sps:$4 sm:$0xff]   ;;  %v3556_v53 = vld [vmem:[#allocation5 + $0x4b0] ss:$8 sps:$4 sm:$0xff]  }
 0x3b7   :  { %v1692_v56 = vmax.f32 %v1687_v52, 0.0  ;;  %v3558_v52 = vld [vmem:[#allocation5 + $0x4b4] ss:$8 sps:$4 sm:$0xff]   ;;  %v3559_v55 = vld [vmem:[#allocation5 + $0x4c0] ss:$8 sps:$4 sm:$0xff]  }
 0x3b8   :  { %v3859_v57 = vadd.f32 %v1691_v54, %v3840_v26  ;;  %v3481_v26 = vld [vmem:[#allocation5 + $0x320] ss:$8 sps:$4 sm:$0xff]   ;;  %v3561_v54 = vld [vmem:[#allocation5 + $0x4c4] ss:$8 sps:$4 sm:$0xff]  }
 0x3b9   :  { %v3862_v58 = vadd.f32 %v1692_v56, %v3842_v27  ;;  %v3484_v27 = vld [vmem:[#allocation5 + $0x330] ss:$8 sps:$4 sm:$0xff]   ;;  %2426 = vmatpush1.bf16.msra.mxu0 %v3550_v49  ;;  %v3564_v56 = vld [vmem:[#allocation5 + $0x4d4] ss:$8 sps:$4 sm:$0xff]  }
 0x3ba   :  { %v1695_v61 = vpack.c.bf16 %v3859_v57, %v3859_v57  ;;  %2427 = vmatprep.subr.bf16.mxu0 %v3555_v50 }
 0x3bb   :  { %v1696_v59 = vpack.c.bf16 %v3862_v58, %v3862_v58 }
 0x3bd   :  { %1935 = vmatprep.mubr.bf16.mxu1 %v1696_v59  ;;  %2428 = vmatpush1.bf16.msra.mxu0 %v3553_v51  ;;  %v3562_v59 = vld [vmem:[#allocation5 + $0x4d0] ss:$8 sps:$4 sm:$0xff]  }
 0x3be   :  { %1936 = vmatmul.mubr.bf16.vlgmr.msra.gmra.mrb[12].mxu1 %v1695_v61  ;;  %2429 = vmatprep.subr.bf16.mxu0 %v3558_v52 }
 0x3bf   :  { %2155 = vmatpush1.bf16.msra.mxu1 %v3475_v60  ;;  %v2956_v60 = vld [vmem:[%s3906_s5 + $0x4] ss:$8 sm:$0x3] }
 0x3c0   :  { %2156 = vmatprep.subr.bf16.mxu1 %v3480_v62  ;;  %v1736_v61 = vrot.slane %v2956_v60, %v3826_v5  ;;  %v1740_v62 = vrot.slane %v2956_v60, %v3831_v7  ;;  %v3615_v60 = vld [vmem:[#allocation5 + $0x5e4] ss:$8 sps:$4 sm:$0xff]  }
 0x3c1   :  { %2430 = vmatpush1.bf16.msra.mxu0 %v3556_v53 }
 0x3c2   :  { %2431 = vmatprep.subr.bf16.mxu0 %v3561_v54 }
 0x3c3   :  { %2157 = vmatpush1.bf16.msra.mxu1 %v3478_v63 }
 0x3c4   :  { %2158 = vmatprep.subr.bf16.mxu1 %v3483_v0 }
 0x3c5   :  { %2432 = vmatpush1.bf16.msra.mxu0 %v3559_v55 }
 0x3c6   :  { %2433 = vmatprep.subr.bf16.mxu0 %v3564_v56 }
 0x3c7   :  { %2159 = vmatpush1.bf16.msra.mxu1 %v3481_v26 }
 0x3c8   :  { %2160 = vmatprep.subr.bf16.mxu1 %v3486_v1 }
 0x3c9   :  { %2434 = vmatpush1.bf16.msra.mxu0 %v3562_v59 }
 0x3cb   :  { %2161 = vmatpush1.bf16.msra.mxu1 %v3484_v27 }
 0x3cc   :  { %2162 = vmatprep.subr.bf16.mxu1 %v3489_v2 }
 0x3cf   :  { %2163 = vmatpush1.bf16.msra.mxu1 %v3487_v3 }
 0x3d0   :  { %2164 = vmatprep.subr.bf16.mxu1 %v3492_v4 }
 0x3d3   :  { %2165 = vmatpush1.bf16.msra.mxu1 %v3490_v6 }
 0x3d4   :  { %2166 = vmatprep.subr.bf16.mxu1 %v3495_v8 }
 0x3d7   :  { %2167 = vmatpush1.bf16.msra.mxu1 %v3493_v9  ;;  %v3567_v9 = vld [vmem:[#allocation5 + $0x4e4] ss:$8 sps:$4 sm:$0xff]  }
 0x3d8   :  { %2168 = vmatprep.subr.bf16.mxu1 %v3498_v10  ;;  %v3565_v10 = vld [vmem:[#allocation5 + $0x4e0] ss:$8 sps:$4 sm:$0xff]   ;;  %2435 = vmatprep.subr.bf16.mxu0 %v3567_v9 }
 0x3d9   :  { %2436 = vmatpush1.bf16.msra.mxu0 %v3565_v10 }
 0x3db   :  { %2169 = vmatpush1.bf16.msra.mxu1 %v3496_v11  ;;  %v3570_v11 = vld [vmem:[#allocation5 + $0x4f4] ss:$8 sps:$4 sm:$0xff]  }
 0x3dc   :  { %2170 = vmatprep.subr.bf16.mxu1 %v3501_v12  ;;  %v3568_v12 = vld [vmem:[#allocation5 + $0x4f0] ss:$8 sps:$4 sm:$0xff]   ;;  %2437 = vmatprep.subr.bf16.mxu0 %v3570_v11  ;;  %v3055_v11 = vld [vmem:[%s3906_s5 + $0x7] ss:$8 sm:$0x3] }
 0x3dd   :  { %2438 = vmatpush1.bf16.msra.mxu0 %v3568_v12  ;;  %v2491_v12 = vrot.slane %v3055_v11, %v3826_v5 }
 0x3df   :  { %2171 = vmatpush1.bf16.msra.mxu1 %v3499_v13  ;;  %v3571_v13 = vld [vmem:[#allocation5 + $0x500] ss:$8 sps:$4 sm:$0xff]  }
 0x3e0   :  { %2172 = vmatprep.subr.bf16.mxu1 %v3504_v14  ;;  %v3573_v14 = vld [vmem:[#allocation5 + $0x504] ss:$8 sps:$4 sm:$0xff]  }
 0x3e3   :  { %2173 = vmatpush1.bf16.msra.mxu1 %v3502_v15  ;;  %v3576_v15 = vld [vmem:[#allocation5 + $0x514] ss:$8 sps:$4 sm:$0xff]  }
 0x3e4   :  { %2174 = vmatprep.subr.bf16.mxu1 %v3507_v16  ;;  %v3574_v16 = vld [vmem:[#allocation5 + $0x510] ss:$8 sps:$4 sm:$0xff]  }
 0x3e7   :  { %2175 = vmatpush1.bf16.msra.mxu1 %v3505_v17  ;;  %v3579_v17 = vld [vmem:[#allocation5 + $0x524] ss:$8 sps:$4 sm:$0xff]  }
 0x3e8   :  { %2176 = vmatprep.subr.bf16.mxu1 %v3510_v18  ;;  %v3577_v18 = vld [vmem:[#allocation5 + $0x520] ss:$8 sps:$4 sm:$0xff]  }
 0x3eb   :  { %2177 = vmatpush1.bf16.msra.mxu1 %v3508_v19  ;;  %v3582_v19 = vld [vmem:[#allocation5 + $0x534] ss:$8 sps:$4 sm:$0xff]  }
 0x3ec   :  { %2178 = vmatprep.subr.bf16.mxu1 %v3513_v20  ;;  %v3580_v20 = vld [vmem:[#allocation5 + $0x530] ss:$8 sps:$4 sm:$0xff]  }
 0x3ef   :  { %2179 = vmatpush1.bf16.msra.mxu1 %v3511_v21  ;;  %v3585_v21 = vld [vmem:[#allocation5 + $0x544] ss:$8 sps:$4 sm:$0xff]  }
 0x3f0   :  { %2180 = vmatprep.subr.bf16.mxu1 %v3516_v23  ;;  %v3583_v23 = vld [vmem:[#allocation5 + $0x540] ss:$8 sps:$4 sm:$0xff]  }
 0x3f3   :  { %2181 = vmatpush1.bf16.msra.mxu1 %v3514_v24  ;;  %v3588_v24 = vld [vmem:[#allocation5 + $0x554] ss:$8 sps:$4 sm:$0xff]  }
 0x3f4   :  { %2182 = vmatprep.subr.bf16.mxu1 %v3519_v25  ;;  %v3586_v25 = vld [vmem:[#allocation5 + $0x550] ss:$8 sps:$4 sm:$0xff]  }
 0x3f7   :  { %2183 = vmatpush1.bf16.msra.mxu1 %v3517_v28  ;;  %v3591_v28 = vld [vmem:[#allocation5 + $0x564] ss:$8 sps:$4 sm:$0xff]  }
 0x3f8   :  { %2184 = vmatprep.subr.bf16.mxu1 %v3522_v29  ;;  %v3589_v29 = vld [vmem:[#allocation5 + $0x560] ss:$8 sps:$4 sm:$0xff]  }
 0x3fb   :  { %2185 = vmatpush1.bf16.msra.mxu1 %v3520_v30  ;;  %v3594_v30 = vld [vmem:[#allocation5 + $0x574] ss:$8 sps:$4 sm:$0xff]  }
 0x3fc   :  { %2658 = vmatprep.subr.bf16.mxu1 %v3573_v14 }
 0x491   :  { %v1937_v63 = vpop.f32.mrb[12].mxu1 }
 0x492   :  { %v1938_v0 = vadd.f32 %v1937_v63, %v1736_v61  ;;  %v1939_v26 = vpop.f32.mrb[13].mxu1  ;;  %v3613_v61 = vld [vmem:[#allocation5 + $0x5e0] ss:$8 sps:$4 sm:$0xff]   ;;  %v3616_v63 = vld [vmem:[#allocation5 + $0x5f0] ss:$8 sps:$4 sm:$0xff]  }
 0x493   :  { %v1940_v1 = vadd.f32 %v1939_v26, %v1740_v62  ;;  %v1941_v27 = vpop.f32.mrb[14].mxu1  ;;  %v3618_v62 = vld [vmem:[#allocation5 + $0x5f4] ss:$8 sps:$4 sm:$0xff]  }
 0x494   :  { %v1944_v2 = vmax.f32 %v1938_v0, 0.0  ;;  %v1942_v3 = vpop.f32.mrb[15].mxu1  ;;  %v3022_v0 = vld [vmem:[%s3906_s5 + $0x6] ss:$8 sm:$0x3] }
 0x495   :  { %v1945_v4 = vmax.f32 %v1940_v1, 0.0 }
 0x496   :  { %v1946_v8 = vpack.c.bf16 %v1944_v2, %v1944_v2 }
 0x497   :  { %v1947_v6 = vpack.c.bf16 %v1945_v4, %v1945_v4 }
 0x499   :  { %2186 = vmatprep.mubr.bf16.mxu1 %v1947_v6 }
 0x49a   :  { %2187 = vmatmul.mubr.bf16.vlgmr.msra.gmra.mrb[16].mxu1 %v1946_v8 }
 0x49b   :  { %2659 = vmatpush1.bf16.msra.mxu1 %v3571_v13  ;;  %v2495_v13 = vrot.slane %v3055_v11, %v3831_v7 }
 0x49c   :  { %2660 = vmatprep.subr.bf16.mxu1 %v3576_v15  ;;  %v2703_v15 = vld [vmem:[%s3907_s6] sm:$0x3] }
 0x49f   :  { %2661 = vmatpush1.bf16.msra.mxu1 %v3574_v16 }
 0x4a0   :  { %2662 = vmatprep.subr.bf16.mxu1 %v3579_v17 }
 0x4a3   :  { %2663 = vmatpush1.bf16.msra.mxu1 %v3577_v18 }
 0x4a4   :  { %2664 = vmatprep.subr.bf16.mxu1 %v3582_v19 }
 0x4a7   :  { %2665 = vmatpush1.bf16.msra.mxu1 %v3580_v20 }
 0x4a8   :  { %2666 = vmatprep.subr.bf16.mxu1 %v3585_v21 }
 0x4ab   :  { %2667 = vmatpush1.bf16.msra.mxu1 %v3583_v23  ;;  %v2708_v23 = vrot.slane %v2703_v15, %v3826_v5 }
 0x4ac   :  { %2668 = vmatprep.subr.bf16.mxu1 %v3588_v24 }
 0x4af   :  { %2669 = vmatpush1.bf16.msra.mxu1 %v3586_v25  ;;  %v2712_v25 = vrot.slane %v2703_v15, %v3831_v7 }
 0x4b0   :  { %2670 = vmatprep.subr.bf16.mxu1 %v3591_v28 }
 0x4b3   :  { %2671 = vmatpush1.bf16.msra.mxu1 %v3589_v29 }
 0x4b4   :  { %2672 = vmatprep.subr.bf16.mxu1 %v3594_v30 }
 0x4b7   :  { %2673 = vmatpush1.bf16.msra.mxu1 %v3592_v31 }
 0x4b8   :  { %2674 = vmatprep.subr.bf16.mxu1 %v3597_v22 }
 0x4bb   :  { %2675 = vmatpush1.bf16.msra.mxu1 %v3595_v32  ;;  %v2721_v32 = vstv %s3908_s7 }
 0x4bc   :  { %2676 = vmatprep.subr.bf16.mxu1 %v3600_v33 }
 0x4bf   :  { %2677 = vmatpush1.bf16.msra.mxu1 %v3598_v34 }
 0x4c0   :  { %2678 = vmatprep.subr.bf16.mxu1 %v3603_v35 }
 0x4c3   :  { %2679 = vmatpush1.bf16.msra.mxu1 %v3601_v36 }
 0x4c4   :  { %2680 = vmatprep.subr.bf16.mxu1 %v3606_v37 }
 0x4c7   :  { %2681 = vmatpush1.bf16.msra.mxu1 %v3604_v38 }
 0x4c8   :  { %2682 = vmatprep.subr.bf16.mxu1 %v3609_v39 }
 0x4cb   :  { %2683 = vmatpush1.bf16.msra.mxu1 %v3607_v40 }
 0x4cc   :  { %2684 = vmatprep.subr.bf16.mxu1 %v3612_v41 }
 0x4cf   :  { %2685 = vmatpush1.bf16.msra.mxu1 %v3610_v42 }
 0x4d0   :  { %2686 = vmatprep.subr.bf16.mxu1 %v3615_v60 }
 0x4d3   :  { %2687 = vmatpush1.bf16.msra.mxu1 %v3613_v61 }
 0x4d4   :  { %2688 = vmatprep.subr.bf16.mxu1 %v3618_v62 }
 0x4d7   :  { %2689 = vmatpush1.bf16.msra.mxu1 %v3616_v63 }
 0x56d   :  { %v2188_v46 = vpop.f32.mrb[16].mxu1 }
 0x56e   :  { %v2189_v47 = vadd.f32 %v2188_v46, %v1987_v44  ;;  %v2190_v48 = vpop.f32.mrb[17].mxu1 }
 0x56f   :  { %v2191_v49 = vadd.f32 %v2190_v48, %v1991_v45  ;;  %v2192_v50 = vpop.f32.mrb[18].mxu1 }
 0x570   :  { %v2195_v51 = vmax.f32 %v2189_v47, 0.0  ;;  %v2193_v52 = vpop.f32.mrb[19].mxu1 }
 0x571   :  { %v2196_v53 = vmax.f32 %v2191_v49, 0.0 }
 0x572   :  { %v2197_v54 = vadd.f32 %v2195_v51, %v3859_v57  ;;  %v2240_v57 = vrot.slane %v3022_v0, %v3826_v5 }
 0x573   :  { %v2198_v55 = vadd.f32 %v2196_v53, %v3862_v58  ;;  %v2244_v58 = vrot.slane %v3022_v0, %v3831_v7 }
 0x574   :  { %v2199_v59 = vpack.c.bf16 %v2197_v54, %v2197_v54 }
 0x575   :  { %v2200_v56 = vpack.c.bf16 %v2198_v55, %v2198_v55 }
 0x577   :  { %2439 = vmatprep.mubr.bf16.mxu0 %v2200_v56 }
 0x578   :  { %2440 = vmatmul.mubr.bf16.vlgmr.msra.gmra.mrb[4].mxu0 %v2199_v59 }
 0x64b   :  { %v2441_v26 = vpop.f32.mrb[4].mxu0 }
 0x64c   :  { %v2442_v1 = vadd.f32 %v2441_v26, %v2240_v57  ;;  %v2443_v27 = vpop.f32.mrb[5].mxu0 }
 0x64d   :  { %v2444_v2 = vadd.f32 %v2443_v27, %v2244_v58  ;;  %v2445_v3 = vpop.f32.mrb[6].mxu0 }
 0x64e   :  { %v2448_v4 = vmax.f32 %v2442_v1, 0.0  ;;  %v2446_v6 = vpop.f32.mrb[7].mxu0 }
 0x64f   :  { %v2449_v8 = vmax.f32 %v2444_v2, 0.0 }
 0x650   :  { %v2450_v10 = vpack.c.bf16 %v2448_v4, %v2448_v4 }
 0x651   :  { %v2451_v9 = vpack.c.bf16 %v2449_v8, %v2449_v8 }
 0x653   :  { %2690 = vmatprep.mubr.bf16.mxu1 %v2451_v9 }
 0x654   :  { %2691 = vmatmul.mubr.bf16.vlgmr.msra.gmra.mrb[20].mxu1 %v2450_v10 }
 0x727   :  { %v2692_v14 = vpop.f32.mrb[20].mxu1 }
 0x728   :  { %v2693_v16 = vadd.f32 %v2692_v14, %v2491_v12  ;;  %v2694_v17 = vpop.f32.mrb[21].mxu1 }
 0x729   :  { %v2695_v18 = vadd.f32 %v2694_v17, %v2495_v13  ;;  %v2696_v19 = vpop.f32.mrb[22].mxu1 }
 0x72a   :  { %v2699_v20 = vmax.f32 %v2693_v16, 0.0  ;;  %v2697_v21 = vpop.f32.mrb[23].mxu1 }
 0x72b   :  { %v2700_v24 = vmax.f32 %v2695_v18, 0.0 }
 0x72c   :  { %v2701_v28 = vadd.f32 %v2699_v20, %v2197_v54 }
 0x72d   :  { %v2702_v29 = vadd.f32 %v2700_v24, %v2198_v55 }
 0x72e   :  { %v2715_v30 = vmul.f32 %v2708_v23, %v2701_v28 }
 0x72f   :  { %v2716_v31 = vmul.f32 %v2712_v25, %v2702_v29 }
 0x731   :  { %v2717_v22 = vadd.f32 %v2716_v31, %v2715_v30 }
 0x733   :  { %2718 = vadd.xlane.f32.xlu0 %v2717_v22 }
 0x7c0   :  { %v2719_v33 = vpop.xlane.xlu0 %2718 }
 0x7c1   :  { %v2722_v34 = vadd.f32 %v2721_v32, %v2719_v33 }
 0x7c3   :  { %v2723_v35 = vsub.f32 0.0, %v2722_v34 }
 0x7c5   :  { %v2724_v36 = vmul.f32 1.442695, %v2723_v35 }
 0x7c7   :  { %3619 = vpow2.f32 %v2724_v36 }
 0x7d1   :  { %v3620_v37 = vpop.eup %3619 }
 0x7d2   :  { %v2726_v5 = vadd.f32 1.0, %v3620_v37 }
 0x7d4   :  { %3621 = vrcp.f32 %v2726_v5 }
 0x7de   :  { %v3622_v7 = vpop.eup %3621 }
 0x7df   :  { %2730 = vst.msk [vmem:[%s3909_s8] sm:$0xff] %vm2729_vm0, %v3622_v7 }
 0x7e0   :  { %2735 = vsyncpa [#allocation4], 1 }
 0x7e1   :  { %2736 = vsyncpa [#allocation6], 1 }

</bundles_post_ra>
